<compile_context>
chip_gen: v6e
topology: v6e:2x2x1
jax: 0.10.0
libtpu: 0.0.40
codegen_flags: <defaults>
</compile_context>

<pallas_src>
import functools

import jax
import jax.numpy as jnp
from jax.experimental import pallas as pl
from jax.experimental.pallas import tpu as pltpu


def _round_up(x: int, m: int) -> int:
    return (x + m - 1) // m * m


def _sigmoid(x):
    # Single EUP push (tanh) instead of exp + reciprocal.
    return 0.5 * jnp.tanh(0.5 * x) + 0.5


def _lstm_kernel(x_ref, wih_ref, whh_ref, bias_ref, o_ref,
                 gx_sc, h_sc, c_sc, *, t_blk, hp):
    """One grid step == T_BLK LSTM time steps for one batch block.

    grid = (batch_blocks ["parallel"], time_blocks ["arbitrary"]).
    NOTE: time MUST remain the innermost, sequentially-iterated grid axis --
    h_sc / c_sc carry the recurrent state across it (reset at t-block 0).

    x_ref   : (B_BLK, T_BLK, Ip)    raw inputs (batch-major, as given)
    wih_ref : (Ip, 4*Hp)            input->hidden weights  (gate blocks i,f,g,o)
    whh_ref : (Hp, 4*Hp)            hidden->hidden weights (gate blocks i,f,g,o)
    bias_ref: (1, 4*Hp)             b_ih + b_hh (f32)
    o_ref   : (B_BLK, T_BLK, Hp)    hidden states, batch-major
    gx_sc   : (T_BLK, B_BLK, 4*Hp)  per-block x-projection scratch (f32)
    h_sc/c_sc: (B_BLK, Hp)          recurrent state (persists over time blocks)
    """
    # New batch block -> reset recurrent state (time axis restarts at 0).
    @pl.when(pl.program_id(1) == 0)
    def _():
        h_sc[...] = jnp.zeros_like(h_sc)
        c_sc[...] = jnp.zeros_like(c_sc)

    wih = wih_ref[...]
    whh = whh_ref[...]
    bias = bias_ref[...]
    xb = x_ref[...]                                    # (B_BLK, T_BLK, Ip)

    # ---- parallel prologue (off the serial h->h chain): input projection ---
    for j in range(t_blk):
        xj = xb[:, j, :].astype(wih.dtype)             # (B_BLK, Ip)
        gx_sc[j] = jnp.dot(xj, wih,
                           preferred_element_type=jnp.float32) + bias

    # ---- serial recurrence: h/c stay in vregs across the unrolled block ----
    # TODO(synk): on v5e, staging W_hh once per block via pltpu.matmul_push_rhs
    # / matmul_acc_lhs would avoid re-pushing the RHS through the MXU each step.
    h = h_sc[...]
    c = c_sc[...]
    for j in range(t_blk):
        gates = gx_sc[j] + jnp.dot(h.astype(whh.dtype), whh,
                                   preferred_element_type=jnp.float32)
        # Lane-aligned gate slices (Hp is a multiple of 128).
        i_g = _sigmoid(gates[:, 0 * hp:1 * hp])
        f_g = _sigmoid(gates[:, 1 * hp:2 * hp])
        g_g = jnp.tanh(gates[:, 2 * hp:3 * hp])
        o_g = _sigmoid(gates[:, 3 * hp:4 * hp])
        c = f_g * c + i_g * g_g
        h = o_g * jnp.tanh(c)
        # Batch-major store (static window on the time dim): output leaves the
        # kernel already in (B, T, H) layout -> no post-kernel transpose.
        o_ref[:, pl.ds(j, 1), :] = h.reshape(h.shape[0], 1, hp).astype(o_ref.dtype)

    h_sc[...] = h
    c_sc[...] = c


def _choose_tiles(B, T, Ip, Hp, w_bytes):
    """VMEM/vreg-budget-aware tile selection (all Python ints, static)."""
    Bp = _round_up(max(B, 1), 8)
    # Cap the batch block so the unrolled time loop's live set (h, c, gate
    # temporaries) stays within the 64-vreg register file.
    B_BLK = min(Bp, 64 if Hp <= 128 else 32)
    # Expose >=2 batch blocks when possible so v7x's two TensorCores can each
    # take a shard of the "parallel" axis (near-free on single-TC chips).
    if Bp >= 16 and Bp // B_BLK < 2:
        B_BLK = _round_up((Bp + 1) // 2, 8)
    Bp = _round_up(Bp, B_BLK)

    # VMEM budget for the resident/pipelined buffers (fits default scoped
    # limits on v6e/v7x; an explicit vmem_limit_bytes covers v5e headroom).
    budget = 24 * 1024 * 1024
    fixed = (2 * Ip * 4 * Hp * w_bytes        # W_ih (double-buffered)
             + 2 * Hp * 4 * Hp * w_bytes      # W_hh (double-buffered)
             + 2 * 4 * Hp * 4                 # bias
             + 2 * B_BLK * Hp * 4)            # h / c scratch
    per_t = B_BLK * (4 * Hp * 4               # gx scratch
                     + 2 * Hp * 4             # out block (double-buffered)
                     + 2 * Ip * 4)            # x block  (double-buffered)
    left = max(budget - fixed, 0)
    T_BLK = 16 if left // per_t >= 16 else 8
    T_BLK = min(T_BLK, _round_up(T, 8))
    Tp = _round_up(T, T_BLK)
    return Bp, B_BLK, Tp, T_BLK


@functools.partial(jax.jit, static_argnames=("hidden_size", "matmul_dtype"))
def lstm_block_forward(x, w_ih, w_hh, b_ih, b_hh, *, hidden_size,
                       matmul_dtype=jnp.bfloat16):
    """Equivalent of LSTMBlock.forward (batch_first=True, zero h0/c0).

    x:    (B, T, I) float32
    w_ih: (4H, I), w_hh: (4H, H), b_ih/b_hh: (4H,)  -- PyTorch parameter layout
    returns: (B, T, H) float32
    """
    assert x.ndim == 3, (
        f"input shape expected to be (batch, seq, input), got {x.shape}")
    B, T, I = x.shape
    H = int(hidden_size)
    assert I == w_ih.shape[1], (
        f"input size expected to be {w_ih.shape[1]}, got {I}")

    f32 = jnp.float32
    Hp = _round_up(H, 128)                    # lane-align the gate blocks
    Ip = _round_up(I, 8)                      # sublane-align x features
    w_bytes = jnp.dtype(matmul_dtype).itemsize
    Bp, B_BLK, Tp, T_BLK = _choose_tiles(B, T, Ip, Hp, w_bytes)

    # --- parameter re-layout (tiny; folded by XLA) ---------------------------
    # (4H, I) -> (Ip, 4*Hp): gate order [i, f, g, o] preserved; each gate block
    # zero-padded to lane width Hp, features zero-padded to Ip.  Zero padding
    # keeps the padded hidden lanes exactly zero through the recurrence.
    wih_k = jnp.transpose(w_ih.astype(f32).reshape(4, H, I), (2, 0, 1))
    wih_k = jnp.pad(wih_k, ((0, Ip - I), (0, 0), (0, Hp - H)))
    wih_k = wih_k.reshape(Ip, 4 * Hp).astype(matmul_dtype)
    # (4H, H) -> (Hp, 4*Hp)
    whh_k = jnp.transpose(w_hh.astype(f32).reshape(4, H, H), (2, 0, 1))
    whh_k = jnp.pad(whh_k, ((0, Hp - H), (0, 0), (0, Hp - H)))
    whh_k = whh_k.reshape(Hp, 4 * Hp).astype(matmul_dtype)
    bias_k = jnp.pad((b_ih + b_hh).astype(f32).reshape(4, H),
                     ((0, 0), (0, Hp - H))).reshape(1, 4 * Hp)

    # x stays batch-major (no wrapper transpose).  Zero padding is harmless:
    # padded batch rows never mix with valid rows, padded time steps come
    # after every valid step, padded features hit zero weight rows.
    xp = jnp.pad(x.astype(f32), ((0, Bp - B), (0, Tp - T), (0, Ip - I)))

    kernel = functools.partial(_lstm_kernel, t_blk=T_BLK, hp=Hp)

    out = pl.pallas_call(
        kernel,
        out_shape=jax.ShapeDtypeStruct((Bp, Tp, Hp), f32),
        grid_spec=pltpu.PrefetchScalarGridSpec(
            num_scalar_prefetch=0,
            grid=(Bp // B_BLK, Tp // T_BLK),
            in_specs=[
                pl.BlockSpec((B_BLK, T_BLK, Ip), lambda b, t: (b, t, 0)),
                pl.BlockSpec((Ip, 4 * Hp), lambda b, t: (0, 0)),
                pl.BlockSpec((Hp, 4 * Hp), lambda b, t: (0, 0)),
                pl.BlockSpec((1, 4 * Hp), lambda b, t: (0, 0)),
            ],
            out_specs=pl.BlockSpec((B_BLK, T_BLK, Hp), lambda b, t: (b, t, 0)),
            scratch_shapes=[
                pltpu.VMEM((T_BLK, B_BLK, 4 * Hp), f32),   # gx (fused x-proj)
                pltpu.VMEM((B_BLK, Hp), f32),              # h state
                pltpu.VMEM((B_BLK, Hp), f32),              # c state
            ],
        ),
        compiler_params=pltpu.CompilerParams(
            # Batch blocks are independent (megacore-shardable on v7x); time is
            # a true recurrence and must stay "arbitrary" (innermost, serial).
            dimension_semantics=("parallel", "arbitrary"),
            vmem_limit_bytes=48 * 1024 * 1024,
        ),
    )(xp, wih_k, whh_k, bias_k)

    # Strip padding; output is already batch-major (B, T, H).
    return out[:B, :T, :H]


def _lstm_reference(x, w_ih, w_hh, b_ih, b_hh, hidden_size):
    """Pure-JAX reference matching torch.nn.LSTM (batch_first, zero init)."""
    B, T, I = x.shape
    H = hidden_size
    bias = b_ih + b_hh
    hi = jax.lax.Precision.HIGHEST

    def step(carry, x_t):
        h, c = carry
        gates = (jnp.dot(x_t, w_ih.T, precision=hi)
                 + jnp.dot(h, w_hh.T, precision=hi) + bias)
        i = jax.nn.sigmoid(gates[:, 0 * H:1 * H])
        f = jax.nn.sigmoid(gates[:, 1 * H:2 * H])
        g = jnp.tanh(gates[:, 2 * H:3 * H])
        o = jax.nn.sigmoid(gates[:, 3 * H:4 * H])
        c_new = f * c + i * g
        h_new = o * jnp.tanh(c_new)
        return (h_new, c_new), h_new

    h0 = jnp.zeros((B, H), jnp.float32)
    c0 = jnp.zeros((B, H), jnp.float32)
    _, hs = jax.lax.scan(step, (h0, c0), jnp.transpose(x, (1, 0, 2)))
    return jnp.transpose(hs, (1, 0, 2))


if __name__ == "__main__":
    # Small shapes consistent with the module: (batch, seq_len, input_size).
    B, T, INPUT_SIZE, HIDDEN_SIZE = 2, 8, 4, 32

    key = jax.random.PRNGKey(0)
    kx, k1, k2, k3, k4 = jax.random.split(key, 5)

    # Same init scheme as torch.nn.LSTM: uniform(-1/sqrt(H), 1/sqrt(H)).
    bound = 1.0 / (HIDDEN_SIZE ** 0.5)
    w_ih = jax.random.uniform(k1, (4 * HIDDEN_SIZE, INPUT_SIZE),
                              minval=-bound, maxval=bound, dtype=jnp.float32)
    w_hh = jax.random.uniform(k2, (4 * HIDDEN_SIZE, HIDDEN_SIZE),
                              minval=-bound, maxval=bound, dtype=jnp.float32)
    b_ih = jax.random.uniform(k3, (4 * HIDDEN_SIZE,),
                              minval=-bound, maxval=bound, dtype=jnp.float32)
    b_hh = jax.random.uniform(k4, (4 * HIDDEN_SIZE,),
                              minval=-bound, maxval=bound, dtype=jnp.float32)

    x = jax.random.normal(kx, (B, T, INPUT_SIZE), dtype=jnp.float32)

    ref = _lstm_reference(x, w_ih, w_hh, b_ih, b_hh, HIDDEN_SIZE)

    # Default (fast) path: bf16 MXU matmuls with f32 accumulation.
    out = lstm_block_forward(x, w_ih, w_hh, b_ih, b_hh,
                             hidden_size=HIDDEN_SIZE)
    out = jax.block_until_ready(out)
    assert out.shape == (B, T, HIDDEN_SIZE)
    max_err = float(jnp.max(jnp.abs(out - ref)))
    assert jnp.allclose(out, ref, atol=2e-2, rtol=2e-2), (
        f"bf16 path max abs err {max_err}")

    # f32 path reproduces the PyTorch f32 numerics tightly.
    out_f32 = lstm_block_forward(x, w_ih, w_hh, b_ih, b_hh,
                                 hidden_size=HIDDEN_SIZE,
                                 matmul_dtype=jnp.float32)
    out_f32 = jax.block_until_ready(out_f32)
    max_err32 = float(jnp.max(jnp.abs(out_f32 - ref)))
    assert jnp.allclose(out_f32, ref, atol=1e-4, rtol=1e-4), (
        f"f32 path max abs err {max_err32}")

    print("KERNEL_OK")
</pallas_src>

<mosaic_0001>
module attributes {stable_mosaic.version = 11 : i64} {
  func.func @_lstm_kernel(%arg0: i32, %arg1: i32, %arg2: memref<8x8x8xf32, #tpu.memory_space<vmem>>, %arg3: memref<8x512xbf16, #tpu.memory_space<vmem>>, %arg4: memref<128x512xbf16, #tpu.memory_space<vmem>>, %arg5: memref<1x512xf32, #tpu.memory_space<vmem>>, %arg6: memref<8x8x128xf32, #tpu.memory_space<vmem>>, %arg7: memref<8x8x512xf32, #tpu.memory_space<vmem>>, %arg8: memref<8x128xf32, #tpu.memory_space<vmem>>, %arg9: memref<8x128xf32, #tpu.memory_space<vmem>>) attributes {dimension_semantics = [#tpu.dimension_semantics<parallel>, #tpu.dimension_semantics<arbitrary>], iteration_bounds = array<i64: 1, 1>, scalar_prefetch = 0 : i64, scratch_operands = 3 : i64, tpu.core_type = #tpu.core_type<tc>, window_params = [{transform_indices = @transform_0, window_bounds = array<i64: 8, 8, 8>}, {pipeline_mode = #tpu.pipeline_mode<synchronous>, transform_indices = @transform_1, window_bounds = array<i64: 8, 512>}, {pipeline_mode = #tpu.pipeline_mode<synchronous>, transform_indices = @transform_2, window_bounds = array<i64: 128, 512>}, {pipeline_mode = #tpu.pipeline_mode<synchronous>, transform_indices = @transform_3, window_bounds = array<i64: 1, 512>}, {transform_indices = @transform_4, window_bounds = array<i64: 8, 8, 128>}]} {
    %c0_i32 = arith.constant 0 : i32
    %0 = arith.cmpi eq, %arg1, %c0_i32 : i32
    %1 = arith.extui %0 : i1 to i32
    %c0_i32_0 = arith.constant 0 : i32
    %2 = arith.cmpi ne, %1, %c0_i32_0 : i32
    scf.if %2 {
      %cst_169 = arith.constant 0.000000e+00 : f32
      %387 = vector.broadcast %cst_169 : f32 to vector<8x128xf32>
      %c0_170 = arith.constant 0 : index
      %c0_171 = arith.constant 0 : index
      %388 = vector.load %arg8[%c0_170, %c0_171] : memref<8x128xf32, #tpu.memory_space<vmem>>, vector<8x128xf32>
      tpu.vector_store %arg8[%c0_170, %c0_171], %387 {strides = array<i32>} : memref<8x128xf32, #tpu.memory_space<vmem>>, vector<8x128xf32>,
      %cst_172 = arith.constant 0.000000e+00 : f32
      %389 = vector.broadcast %cst_172 : f32 to vector<8x128xf32>
      %c0_173 = arith.constant 0 : index
      %c0_174 = arith.constant 0 : index
      %390 = vector.load %arg9[%c0_173, %c0_174] : memref<8x128xf32, #tpu.memory_space<vmem>>, vector<8x128xf32>
      tpu.vector_store %arg9[%c0_173, %c0_174], %389 {strides = array<i32>} : memref<8x128xf32, #tpu.memory_space<vmem>>, vector<8x128xf32>,
    } else {
    }
    %c0 = arith.constant 0 : index
    %c0_1 = arith.constant 0 : index
    %3 = vector.load %arg3[%c0, %c0_1] : memref<8x512xbf16, #tpu.memory_space<vmem>>, vector<8x512xbf16>
    %c0_2 = arith.constant 0 : index
    %c0_3 = arith.constant 0 : index
    %4 = vector.load %arg4[%c0_2, %c0_3] : memref<128x512xbf16, #tpu.memory_space<vmem>>, vector<128x512xbf16>
    %c0_4 = arith.constant 0 : index
    %c0_5 = arith.constant 0 : index
    %5 = vector.load %arg5[%c0_4, %c0_5] : memref<1x512xf32, #tpu.memory_space<vmem>>, vector<1x512xf32>
    %c0_6 = arith.constant 0 : index
    %c0_7 = arith.constant 0 : index
    %c0_8 = arith.constant 0 : index
    %6 = vector.load %arg2[%c0_6, %c0_7, %c0_8] : memref<8x8x8xf32, #tpu.memory_space<vmem>>, vector<8x8x8xf32>
    %7 = vector.extract_strided_slice %6 {offsets = [0, 0, 0], sizes = [8, 1, 8], strides = [1, 1, 1]} : vector<8x8x8xf32> to vector<8x1x8xf32>
    %8 = vector.shape_cast %7 : vector<8x1x8xf32> to vector<8x8xf32>
    %9 = arith.truncf %8 : vector<8x8xf32> to vector<8x8xbf16>
    %cst = arith.constant dense<0.000000e+00> : vector<8x512xf32>
    %10 = tpu.matmul %9, %3, %cst {dimension_numbers = #tpu.dot_dimension_numbers<[1], [0], [0], [1], [0, 0, 1, 1], [], []>} : vector<8x8xbf16>, vector<8x512xbf16>, vector<8x512xf32> -> vector<8x512xf32>
    %11 = vector.broadcast %5 : vector<1x512xf32> to vector<8x512xf32>
    %12 = arith.addf %10, %11 : vector<8x512xf32>
    %c0_9 = arith.constant 0 : index
    %c0_10 = arith.constant 0 : index
    %c0_11 = arith.constant 0 : index
    %13 = vector.load %arg7[%c0_9, %c0_10, %c0_11] : memref<8x8x512xf32, #tpu.memory_space<vmem>>, vector<1x8x512xf32>
    %14 = vector.shape_cast %13 : vector<1x8x512xf32> to vector<8x512xf32>
    %15 = vector.shape_cast %12 : vector<8x512xf32> to vector<1x8x512xf32>
    tpu.vector_store %arg7[%c0_9, %c0_10, %c0_11], %15 {strides = array<i32>} : memref<8x8x512xf32, #tpu.memory_space<vmem>>, vector<1x8x512xf32>,
    %16 = vector.extract_strided_slice %6 {offsets = [0, 1, 0], sizes = [8, 1, 8], strides = [1, 1, 1]} : vector<8x8x8xf32> to vector<8x1x8xf32>
    %17 = vector.shape_cast %16 : vector<8x1x8xf32> to vector<8x8xf32>
    %18 = arith.truncf %17 : vector<8x8xf32> to vector<8x8xbf16>
    %cst_12 = arith.constant dense<0.000000e+00> : vector<8x512xf32>
    %19 = tpu.matmul %18, %3, %cst_12 {dimension_numbers = #tpu.dot_dimension_numbers<[1], [0], [0], [1], [0, 0, 1, 1], [], []>} : vector<8x8xbf16>, vector<8x512xbf16>, vector<8x512xf32> -> vector<8x512xf32>
    %20 = vector.broadcast %5 : vector<1x512xf32> to vector<8x512xf32>
    %21 = arith.addf %19, %20 : vector<8x512xf32>
    %c1 = arith.constant 1 : index
    %c0_13 = arith.constant 0 : index
    %c0_14 = arith.constant 0 : index
    %22 = vector.load %arg7[%c1, %c0_13, %c0_14] : memref<8x8x512xf32, #tpu.memory_space<vmem>>, vector<1x8x512xf32>
    %23 = vector.shape_cast %22 : vector<1x8x512xf32> to vector<8x512xf32>
    %24 = vector.shape_cast %21 : vector<8x512xf32> to vector<1x8x512xf32>
    tpu.vector_store %arg7[%c1, %c0_13, %c0_14], %24 {strides = array<i32>} : memref<8x8x512xf32, #tpu.memory_space<vmem>>, vector<1x8x512xf32>,
    %25 = vector.extract_strided_slice %6 {offsets = [0, 2, 0], sizes = [8, 1, 8], strides = [1, 1, 1]} : vector<8x8x8xf32> to vector<8x1x8xf32>
    %26 = vector.shape_cast %25 : vector<8x1x8xf32> to vector<8x8xf32>
    %27 = arith.truncf %26 : vector<8x8xf32> to vector<8x8xbf16>
    %cst_15 = arith.constant dense<0.000000e+00> : vector<8x512xf32>
    %28 = tpu.matmul %27, %3, %cst_15 {dimension_numbers = #tpu.dot_dimension_numbers<[1], [0], [0], [1], [0, 0, 1, 1], [], []>} : vector<8x8xbf16>, vector<8x512xbf16>, vector<8x512xf32> -> vector<8x512xf32>
    %29 = vector.broadcast %5 : vector<1x512xf32> to vector<8x512xf32>
    %30 = arith.addf %28, %29 : vector<8x512xf32>
    %c2 = arith.constant 2 : index
    %c0_16 = arith.constant 0 : index
    %c0_17 = arith.constant 0 : index
    %31 = vector.load %arg7[%c2, %c0_16, %c0_17] : memref<8x8x512xf32, #tpu.memory_space<vmem>>, vector<1x8x512xf32>
    %32 = vector.shape_cast %31 : vector<1x8x512xf32> to vector<8x512xf32>
    %33 = vector.shape_cast %30 : vector<8x512xf32> to vector<1x8x512xf32>
    tpu.vector_store %arg7[%c2, %c0_16, %c0_17], %33 {strides = array<i32>} : memref<8x8x512xf32, #tpu.memory_space<vmem>>, vector<1x8x512xf32>,
    %34 = vector.extract_strided_slice %6 {offsets = [0, 3, 0], sizes = [8, 1, 8], strides = [1, 1, 1]} : vector<8x8x8xf32> to vector<8x1x8xf32>
    %35 = vector.shape_cast %34 : vector<8x1x8xf32> to vector<8x8xf32>
    %36 = arith.truncf %35 : vector<8x8xf32> to vector<8x8xbf16>
    %cst_18 = arith.constant dense<0.000000e+00> : vector<8x512xf32>
    %37 = tpu.matmul %36, %3, %cst_18 {dimension_numbers = #tpu.dot_dimension_numbers<[1], [0], [0], [1], [0, 0, 1, 1], [], []>} : vector<8x8xbf16>, vector<8x512xbf16>, vector<8x512xf32> -> vector<8x512xf32>
    %38 = vector.broadcast %5 : vector<1x512xf32> to vector<8x512xf32>
    %39 = arith.addf %37, %38 : vector<8x512xf32>
    %c3 = arith.constant 3 : index
    %c0_19 = arith.constant 0 : index
    %c0_20 = arith.constant 0 : index
    %40 = vector.load %arg7[%c3, %c0_19, %c0_20] : memref<8x8x512xf32, #tpu.memory_space<vmem>>, vector<1x8x512xf32>
    %41 = vector.shape_cast %40 : vector<1x8x512xf32> to vector<8x512xf32>
    %42 = vector.shape_cast %39 : vector<8x512xf32> to vector<1x8x512xf32>
    tpu.vector_store %arg7[%c3, %c0_19, %c0_20], %42 {strides = array<i32>} : memref<8x8x512xf32, #tpu.memory_space<vmem>>, vector<1x8x512xf32>,
    %43 = vector.extract_strided_slice %6 {offsets = [0, 4, 0], sizes = [8, 1, 8], strides = [1, 1, 1]} : vector<8x8x8xf32> to vector<8x1x8xf32>
    %44 = vector.shape_cast %43 : vector<8x1x8xf32> to vector<8x8xf32>
    %45 = arith.truncf %44 : vector<8x8xf32> to vector<8x8xbf16>
    %cst_21 = arith.constant dense<0.000000e+00> : vector<8x512xf32>
    %46 = tpu.matmul %45, %3, %cst_21 {dimension_numbers = #tpu.dot_dimension_numbers<[1], [0], [0], [1], [0, 0, 1, 1], [], []>} : vector<8x8xbf16>, vector<8x512xbf16>, vector<8x512xf32> -> vector<8x512xf32>
    %47 = vector.broadcast %5 : vector<1x512xf32> to vector<8x512xf32>
    %48 = arith.addf %46, %47 : vector<8x512xf32>
    %c4 = arith.constant 4 : index
    %c0_22 = arith.constant 0 : index
    %c0_23 = arith.constant 0 : index
    %49 = vector.load %arg7[%c4, %c0_22, %c0_23] : memref<8x8x512xf32, #tpu.memory_space<vmem>>, vector<1x8x512xf32>
    %50 = vector.shape_cast %49 : vector<1x8x512xf32> to vector<8x512xf32>
    %51 = vector.shape_cast %48 : vector<8x512xf32> to vector<1x8x512xf32>
    tpu.vector_store %arg7[%c4, %c0_22, %c0_23], %51 {strides = array<i32>} : memref<8x8x512xf32, #tpu.memory_space<vmem>>, vector<1x8x512xf32>,
    %52 = vector.extract_strided_slice %6 {offsets = [0, 5, 0], sizes = [8, 1, 8], strides = [1, 1, 1]} : vector<8x8x8xf32> to vector<8x1x8xf32>
    %53 = vector.shape_cast %52 : vector<8x1x8xf32> to vector<8x8xf32>
    %54 = arith.truncf %53 : vector<8x8xf32> to vector<8x8xbf16>
    %cst_24 = arith.constant dense<0.000000e+00> : vector<8x512xf32>
    %55 = tpu.matmul %54, %3, %cst_24 {dimension_numbers = #tpu.dot_dimension_numbers<[1], [0], [0], [1], [0, 0, 1, 1], [], []>} : vector<8x8xbf16>, vector<8x512xbf16>, vector<8x512xf32> -> vector<8x512xf32>
    %56 = vector.broadcast %5 : vector<1x512xf32> to vector<8x512xf32>
    %57 = arith.addf %55, %56 : vector<8x512xf32>
    %c5 = arith.constant 5 : index
    %c0_25 = arith.constant 0 : index
    %c0_26 = arith.constant 0 : index
    %58 = vector.load %arg7[%c5, %c0_25, %c0_26] : memref<8x8x512xf32, #tpu.memory_space<vmem>>, vector<1x8x512xf32>
    %59 = vector.shape_cast %58 : vector<1x8x512xf32> to vector<8x512xf32>
    %60 = vector.shape_cast %57 : vector<8x512xf32> to vector<1x8x512xf32>
    tpu.vector_store %arg7[%c5, %c0_25, %c0_26], %60 {strides = array<i32>} : memref<8x8x512xf32, #tpu.memory_space<vmem>>, vector<1x8x512xf32>,
    %61 = vector.extract_strided_slice %6 {offsets = [0, 6, 0], sizes = [8, 1, 8], strides = [1, 1, 1]} : vector<8x8x8xf32> to vector<8x1x8xf32>
    %62 = vector.shape_cast %61 : vector<8x1x8xf32> to vector<8x8xf32>
    %63 = arith.truncf %62 : vector<8x8xf32> to vector<8x8xbf16>
    %cst_27 = arith.constant dense<0.000000e+00> : vector<8x512xf32>
    %64 = tpu.matmul %63, %3, %cst_27 {dimension_numbers = #tpu.dot_dimension_numbers<[1], [0], [0], [1], [0, 0, 1, 1], [], []>} : vector<8x8xbf16>, vector<8x512xbf16>, vector<8x512xf32> -> vector<8x512xf32>
    %65 = vector.broadcast %5 : vector<1x512xf32> to vector<8x512xf32>
    %66 = arith.addf %64, %65 : vector<8x512xf32>
    %c6 = arith.constant 6 : index
    %c0_28 = arith.constant 0 : index
    %c0_29 = arith.constant 0 : index
    %67 = vector.load %arg7[%c6, %c0_28, %c0_29] : memref<8x8x512xf32, #tpu.memory_space<vmem>>, vector<1x8x512xf32>
    %68 = vector.shape_cast %67 : vector<1x8x512xf32> to vector<8x512xf32>
    %69 = vector.shape_cast %66 : vector<8x512xf32> to vector<1x8x512xf32>
    tpu.vector_store %arg7[%c6, %c0_28, %c0_29], %69 {strides = array<i32>} : memref<8x8x512xf32, #tpu.memory_space<vmem>>, vector<1x8x512xf32>,
    %70 = vector.extract_strided_slice %6 {offsets = [0, 7, 0], sizes = [8, 1, 8], strides = [1, 1, 1]} : vector<8x8x8xf32> to vector<8x1x8xf32>
    %71 = vector.shape_cast %70 : vector<8x1x8xf32> to vector<8x8xf32>
    %72 = arith.truncf %71 : vector<8x8xf32> to vector<8x8xbf16>
    %cst_30 = arith.constant dense<0.000000e+00> : vector<8x512xf32>
    %73 = tpu.matmul %72, %3, %cst_30 {dimension_numbers = #tpu.dot_dimension_numbers<[1], [0], [0], [1], [0, 0, 1, 1], [], []>} : vector<8x8xbf16>, vector<8x512xbf16>, vector<8x512xf32> -> vector<8x512xf32>
    %74 = vector.broadcast %5 : vector<1x512xf32> to vector<8x512xf32>
    %75 = arith.addf %73, %74 : vector<8x512xf32>
    %c7 = arith.constant 7 : index
    %c0_31 = arith.constant 0 : index
    %c0_32 = arith.constant 0 : index
    %76 = vector.load %arg7[%c7, %c0_31, %c0_32] : memref<8x8x512xf32, #tpu.memory_space<vmem>>, vector<1x8x512xf32>
    %77 = vector.shape_cast %76 : vector<1x8x512xf32> to vector<8x512xf32>
    %78 = vector.shape_cast %75 : vector<8x512xf32> to vector<1x8x512xf32>
    tpu.vector_store %arg7[%c7, %c0_31, %c0_32], %78 {strides = array<i32>} : memref<8x8x512xf32, #tpu.memory_space<vmem>>, vector<1x8x512xf32>,
    %c0_33 = arith.constant 0 : index
    %c0_34 = arith.constant 0 : index
    %79 = vector.load %arg8[%c0_33, %c0_34] : memref<8x128xf32, #tpu.memory_space<vmem>>, vector<8x128xf32>
    %c0_35 = arith.constant 0 : index
    %c0_36 = arith.constant 0 : index
    %80 = vector.load %arg9[%c0_35, %c0_36] : memref<8x128xf32, #tpu.memory_space<vmem>>, vector<8x128xf32>
    %c0_37 = arith.constant 0 : index
    %c0_38 = arith.constant 0 : index
    %c0_39 = arith.constant 0 : index
    %81 = vector.load %arg7[%c0_37, %c0_38, %c0_39] : memref<8x8x512xf32, #tpu.memory_space<vmem>>, vector<1x8x512xf32>
    %82 = vector.shape_cast %81 : vector<1x8x512xf32> to vector<8x512xf32>
    %83 = arith.truncf %79 : vector<8x128xf32> to vector<8x128xbf16>
    %cst_40 = arith.constant dense<0.000000e+00> : vector<8x512xf32>
    %84 = tpu.matmul %83, %4, %cst_40 {dimension_numbers = #tpu.dot_dimension_numbers<[1], [0], [0], [1], [0, 0, 1, 1], [], []>} : vector<8x128xbf16>, vector<128x512xbf16>, vector<8x512xf32> -> vector<8x512xf32>
    %85 = arith.addf %82, %84 : vector<8x512xf32>
    %86 = vector.extract_strided_slice %85 {offsets = [0, 0], sizes = [8, 128], strides = [1, 1]} : vector<8x512xf32> to vector<8x128xf32>
    %cst_41 = arith.constant 5.000000e-01 : f32
    %87 = vector.broadcast %cst_41 : f32 to vector<8x128xf32>
    %88 = arith.mulf %87, %86 : vector<8x128xf32>
    %89 = math.tanh %88 : vector<8x128xf32>
    %cst_42 = arith.constant 5.000000e-01 : f32
    %90 = vector.broadcast %cst_42 : f32 to vector<8x128xf32>
    %91 = arith.mulf %90, %89 : vector<8x128xf32>
    %cst_43 = arith.constant 5.000000e-01 : f32
    %92 = vector.broadcast %cst_43 : f32 to vector<8x128xf32>
    %93 = arith.addf %91, %92 : vector<8x128xf32>
    %94 = vector.extract_strided_slice %85 {offsets = [0, 128], sizes = [8, 128], strides = [1, 1]} : vector<8x512xf32> to vector<8x128xf32>
    %cst_44 = arith.constant 5.000000e-01 : f32
    %95 = vector.broadcast %cst_44 : f32 to vector<8x128xf32>
    %96 = arith.mulf %95, %94 : vector<8x128xf32>
    %97 = math.tanh %96 : vector<8x128xf32>
    %cst_45 = arith.constant 5.000000e-01 : f32
    %98 = vector.broadcast %cst_45 : f32 to vector<8x128xf32>
    %99 = arith.mulf %98, %97 : vector<8x128xf32>
    %cst_46 = arith.constant 5.000000e-01 : f32
    %100 = vector.broadcast %cst_46 : f32 to vector<8x128xf32>
    %101 = arith.addf %99, %100 : vector<8x128xf32>
    %102 = vector.extract_strided_slice %85 {offsets = [0, 256], sizes = [8, 128], strides = [1, 1]} : vector<8x512xf32> to vector<8x128xf32>
    %103 = math.tanh %102 : vector<8x128xf32>
    %104 = vector.extract_strided_slice %85 {offsets = [0, 384], sizes = [8, 128], strides = [1, 1]} : vector<8x512xf32> to vector<8x128xf32>
    %cst_47 = arith.constant 5.000000e-01 : f32
    %105 = vector.broadcast %cst_47 : f32 to vector<8x128xf32>
    %106 = arith.mulf %105, %104 : vector<8x128xf32>
    %107 = math.tanh %106 : vector<8x128xf32>
    %cst_48 = arith.constant 5.000000e-01 : f32
    %108 = vector.broadcast %cst_48 : f32 to vector<8x128xf32>
    %109 = arith.mulf %108, %107 : vector<8x128xf32>
    %cst_49 = arith.constant 5.000000e-01 : f32
    %110 = vector.broadcast %cst_49 : f32 to vector<8x128xf32>
    %111 = arith.addf %109, %110 : vector<8x128xf32>
    %112 = arith.mulf %101, %80 : vector<8x128xf32>
    %113 = arith.mulf %93, %103 : vector<8x128xf32>
    %114 = arith.addf %112, %113 : vector<8x128xf32>
    %115 = math.tanh %114 : vector<8x128xf32>
    %116 = arith.mulf %111, %115 : vector<8x128xf32>
    %117 = vector.shape_cast %116 : vector<8x128xf32> to vector<8x1x128xf32>
    %c0_50 = arith.constant 0 : index
    %c0_51 = arith.constant 0 : index
    %c0_52 = arith.constant 0 : index
    %118 = vector.load %arg6[%c0_50, %c0_51, %c0_52] : memref<8x8x128xf32, #tpu.memory_space<vmem>>, vector<8x1x128xf32>
    tpu.vector_store %arg6[%c0_50, %c0_51, %c0_52], %117 {strides = array<i32>} : memref<8x8x128xf32, #tpu.memory_space<vmem>>, vector<8x1x128xf32>,
    %c1_53 = arith.constant 1 : index
    %c0_54 = arith.constant 0 : index
    %c0_55 = arith.constant 0 : index
    %119 = vector.load %arg7[%c1_53, %c0_54, %c0_55] : memref<8x8x512xf32, #tpu.memory_space<vmem>>, vector<1x8x512xf32>
    %120 = vector.shape_cast %119 : vector<1x8x512xf32> to vector<8x512xf32>
    %121 = arith.truncf %116 : vector<8x128xf32> to vector<8x128xbf16>
    %cst_56 = arith.constant dense<0.000000e+00> : vector<8x512xf32>
    %122 = tpu.matmul %121, %4, %cst_56 {dimension_numbers = #tpu.dot_dimension_numbers<[1], [0], [0], [1], [0, 0, 1, 1], [], []>} : vector<8x128xbf16>, vector<128x512xbf16>, vector<8x512xf32> -> vector<8x512xf32>
    %123 = arith.addf %120, %122 : vector<8x512xf32>
    %124 = vector.extract_strided_slice %123 {offsets = [0, 0], sizes = [8, 128], strides = [1, 1]} : vector<8x512xf32> to vector<8x128xf32>
    %cst_57 = arith.constant 5.000000e-01 : f32
    %125 = vector.broadcast %cst_57 : f32 to vector<8x128xf32>
    %126 = arith.mulf %125, %124 : vector<8x128xf32>
    %127 = math.tanh %126 : vector<8x128xf32>
    %cst_58 = arith.constant 5.000000e-01 : f32
    %128 = vector.broadcast %cst_58 : f32 to vector<8x128xf32>
    %129 = arith.mulf %128, %127 : vector<8x128xf32>
    %cst_59 = arith.constant 5.000000e-01 : f32
    %130 = vector.broadcast %cst_59 : f32 to vector<8x128xf32>
    %131 = arith.addf %129, %130 : vector<8x128xf32>
    %132 = vector.extract_strided_slice %123 {offsets = [0, 128], sizes = [8, 128], strides = [1, 1]} : vector<8x512xf32> to vector<8x128xf32>
    %cst_60 = arith.constant 5.000000e-01 : f32
    %133 = vector.broadcast %cst_60 : f32 to vector<8x128xf32>
    %134 = arith.mulf %133, %132 : vector<8x128xf32>
    %135 = math.tanh %134 : vector<8x128xf32>
    %cst_61 = arith.constant 5.000000e-01 : f32
    %136 = vector.broadcast %cst_61 : f32 to vector<8x128xf32>
    %137 = arith.mulf %136, %135 : vector<8x128xf32>
    %cst_62 = arith.constant 5.000000e-01 : f32
    %138 = vector.broadcast %cst_62 : f32 to vector<8x128xf32>
    %139 = arith.addf %137, %138 : vector<8x128xf32>
    %140 = vector.extract_strided_slice %123 {offsets = [0, 256], sizes = [8, 128], strides = [1, 1]} : vector<8x512xf32> to vector<8x128xf32>
    %141 = math.tanh %140 : vector<8x128xf32>
    %142 = vector.extract_strided_slice %123 {offsets = [0, 384], sizes = [8, 128], strides = [1, 1]} : vector<8x512xf32> to vector<8x128xf32>
    %cst_63 = arith.constant 5.000000e-01 : f32
    %143 = vector.broadcast %cst_63 : f32 to vector<8x128xf32>
    %144 = arith.mulf %143, %142 : vector<8x128xf32>
    %145 = math.tanh %144 : vector<8x128xf32>
    %cst_64 = arith.constant 5.000000e-01 : f32
    %146 = vector.broadcast %cst_64 : f32 to vector<8x128xf32>
    %147 = arith.mulf %146, %145 : vector<8x128xf32>
    %cst_65 = arith.constant 5.000000e-01 : f32
    %148 = vector.broadcast %cst_65 : f32 to vector<8x128xf32>
    %149 = arith.addf %147, %148 : vector<8x128xf32>
    %150 = arith.mulf %139, %114 : vector<8x128xf32>
    %151 = arith.mulf %131, %141 : vector<8x128xf32>
    %152 = arith.addf %150, %151 : vector<8x128xf32>
    %153 = math.tanh %152 : vector<8x128xf32>
    %154 = arith.mulf %149, %153 : vector<8x128xf32>
    %155 = vector.shape_cast %154 : vector<8x128xf32> to vector<8x1x128xf32>
    %c0_66 = arith.constant 0 : index
    %c1_67 = arith.constant 1 : index
    %c0_68 = arith.constant 0 : index
    %156 = vector.load %arg6[%c0_66, %c1_67, %c0_68] : memref<8x8x128xf32, #tpu.memory_space<vmem>>, vector<8x1x128xf32>
    tpu.vector_store %arg6[%c0_66, %c1_67, %c0_68], %155 {strides = array<i32>} : memref<8x8x128xf32, #tpu.memory_space<vmem>>, vector<8x1x128xf32>,
    %c2_69 = arith.constant 2 : index
    %c0_70 = arith.constant 0 : index
    %c0_71 = arith.constant 0 : index
    %157 = vector.load %arg7[%c2_69, %c0_70, %c0_71] : memref<8x8x512xf32, #tpu.memory_space<vmem>>, vector<1x8x512xf32>
    %158 = vector.shape_cast %157 : vector<1x8x512xf32> to vector<8x512xf32>
    %159 = arith.truncf %154 : vector<8x128xf32> to vector<8x128xbf16>
    %cst_72 = arith.constant dense<0.000000e+00> : vector<8x512xf32>
    %160 = tpu.matmul %159, %4, %cst_72 {dimension_numbers = #tpu.dot_dimension_numbers<[1], [0], [0], [1], [0, 0, 1, 1], [], []>} : vector<8x128xbf16>, vector<128x512xbf16>, vector<8x512xf32> -> vector<8x512xf32>
    %161 = arith.addf %158, %160 : vector<8x512xf32>
    %162 = vector.extract_strided_slice %161 {offsets = [0, 0], sizes = [8, 128], strides = [1, 1]} : vector<8x512xf32> to vector<8x128xf32>
    %cst_73 = arith.constant 5.000000e-01 : f32
    %163 = vector.broadcast %cst_73 : f32 to vector<8x128xf32>
    %164 = arith.mulf %163, %162 : vector<8x128xf32>
    %165 = math.tanh %164 : vector<8x128xf32>
    %cst_74 = arith.constant 5.000000e-01 : f32
    %166 = vector.broadcast %cst_74 : f32 to vector<8x128xf32>
    %167 = arith.mulf %166, %165 : vector<8x128xf32>
    %cst_75 = arith.constant 5.000000e-01 : f32
    %168 = vector.broadcast %cst_75 : f32 to vector<8x128xf32>
    %169 = arith.addf %167, %168 : vector<8x128xf32>
    %170 = vector.extract_strided_slice %161 {offsets = [0, 128], sizes = [8, 128], strides = [1, 1]} : vector<8x512xf32> to vector<8x128xf32>
    %cst_76 = arith.constant 5.000000e-01 : f32
    %171 = vector.broadcast %cst_76 : f32 to vector<8x128xf32>
    %172 = arith.mulf %171, %170 : vector<8x128xf32>
    %173 = math.tanh %172 : vector<8x128xf32>
    %cst_77 = arith.constant 5.000000e-01 : f32
    %174 = vector.broadcast %cst_77 : f32 to vector<8x128xf32>
    %175 = arith.mulf %174, %173 : vector<8x128xf32>
    %cst_78 = arith.constant 5.000000e-01 : f32
    %176 = vector.broadcast %cst_78 : f32 to vector<8x128xf32>
    %177 = arith.addf %175, %176 : vector<8x128xf32>
    %178 = vector.extract_strided_slice %161 {offsets = [0, 256], sizes = [8, 128], strides = [1, 1]} : vector<8x512xf32> to vector<8x128xf32>
    %179 = math.tanh %178 : vector<8x128xf32>
    %180 = vector.extract_strided_slice %161 {offsets = [0, 384], sizes = [8, 128], strides = [1, 1]} : vector<8x512xf32> to vector<8x128xf32>
    %cst_79 = arith.constant 5.000000e-01 : f32
    %181 = vector.broadcast %cst_79 : f32 to vector<8x128xf32>
    %182 = arith.mulf %181, %180 : vector<8x128xf32>
    %183 = math.tanh %182 : vector<8x128xf32>
    %cst_80 = arith.constant 5.000000e-01 : f32
    %184 = vector.broadcast %cst_80 : f32 to vector<8x128xf32>
    %185 = arith.mulf %184, %183 : vector<8x128xf32>
    %cst_81 = arith.constant 5.000000e-01 : f32
    %186 = vector.broadcast %cst_81 : f32 to vector<8x128xf32>
    %187 = arith.addf %185, %186 : vector<8x128xf32>
    %188 = arith.mulf %177, %152 : vector<8x128xf32>
    %189 = arith.mulf %169, %179 : vector<8x128xf32>
    %190 = arith.addf %188, %189 : vector<8x128xf32>
    %191 = math.tanh %190 : vector<8x128xf32>
    %192 = arith.mulf %187, %191 : vector<8x128xf32>
    %193 = vector.shape_cast %192 : vector<8x128xf32> to vector<8x1x128xf32>
    %c0_82 = arith.constant 0 : index
    %c2_83 = arith.constant 2 : index
    %c0_84 = arith.constant 0 : index
    %194 = vector.load %arg6[%c0_82, %c2_83, %c0_84] : memref<8x8x128xf32, #tpu.memory_space<vmem>>, vector<8x1x128xf32>
    tpu.vector_store %arg6[%c0_82, %c2_83, %c0_84], %193 {strides = array<i32>} : memref<8x8x128xf32, #tpu.memory_space<vmem>>, vector<8x1x128xf32>,
    %c3_85 = arith.constant 3 : index
    %c0_86 = arith.constant 0 : index
    %c0_87 = arith.constant 0 : index
    %195 = vector.load %arg7[%c3_85, %c0_86, %c0_87] : memref<8x8x512xf32, #tpu.memory_space<vmem>>, vector<1x8x512xf32>
    %196 = vector.shape_cast %195 : vector<1x8x512xf32> to vector<8x512xf32>
    %197 = arith.truncf %192 : vector<8x128xf32> to vector<8x128xbf16>
    %cst_88 = arith.constant dense<0.000000e+00> : vector<8x512xf32>
    %198 = tpu.matmul %197, %4, %cst_88 {dimension_numbers = #tpu.dot_dimension_numbers<[1], [0], [0], [1], [0, 0, 1, 1], [], []>} : vector<8x128xbf16>, vector<128x512xbf16>, vector<8x512xf32> -> vector<8x512xf32>
    %199 = arith.addf %196, %198 : vector<8x512xf32>
    %200 = vector.extract_strided_slice %199 {offsets = [0, 0], sizes = [8, 128], strides = [1, 1]} : vector<8x512xf32> to vector<8x128xf32>
    %cst_89 = arith.constant 5.000000e-01 : f32
    %201 = vector.broadcast %cst_89 : f32 to vector<8x128xf32>
    %202 = arith.mulf %201, %200 : vector<8x128xf32>
    %203 = math.tanh %202 : vector<8x128xf32>
    %cst_90 = arith.constant 5.000000e-01 : f32
    %204 = vector.broadcast %cst_90 : f32 to vector<8x128xf32>
    %205 = arith.mulf %204, %203 : vector<8x128xf32>
    %cst_91 = arith.constant 5.000000e-01 : f32
    %206 = vector.broadcast %cst_91 : f32 to vector<8x128xf32>
    %207 = arith.addf %205, %206 : vector<8x128xf32>
    %208 = vector.extract_strided_slice %199 {offsets = [0, 128], sizes = [8, 128], strides = [1, 1]} : vector<8x512xf32> to vector<8x128xf32>
    %cst_92 = arith.constant 5.000000e-01 : f32
    %209 = vector.broadcast %cst_92 : f32 to vector<8x128xf32>
    %210 = arith.mulf %209, %208 : vector<8x128xf32>
    %211 = math.tanh %210 : vector<8x128xf32>
    %cst_93 = arith.constant 5.000000e-01 : f32
    %212 = vector.broadcast %cst_93 : f32 to vector<8x128xf32>
    %213 = arith.mulf %212, %211 : vector<8x128xf32>
    %cst_94 = arith.constant 5.000000e-01 : f32
    %214 = vector.broadcast %cst_94 : f32 to vector<8x128xf32>
    %215 = arith.addf %213, %214 : vector<8x128xf32>
    %216 = vector.extract_strided_slice %199 {offsets = [0, 256], sizes = [8, 128], strides = [1, 1]} : vector<8x512xf32> to vector<8x128xf32>
    %217 = math.tanh %216 : vector<8x128xf32>
    %218 = vector.extract_strided_slice %199 {offsets = [0, 384], sizes = [8, 128], strides = [1, 1]} : vector<8x512xf32> to vector<8x128xf32>
    %cst_95 = arith.constant 5.000000e-01 : f32
    %219 = vector.broadcast %cst_95 : f32 to vector<8x128xf32>
    %220 = arith.mulf %219, %218 : vector<8x128xf32>
    %221 = math.tanh %220 : vector<8x128xf32>
    %cst_96 = arith.constant 5.000000e-01 : f32
    %222 = vector.broadcast %cst_96 : f32 to vector<8x128xf32>
    %223 = arith.mulf %222, %221 : vector<8x128xf32>
    %cst_97 = arith.constant 5.000000e-01 : f32
    %224 = vector.broadcast %cst_97 : f32 to vector<8x128xf32>
    %225 = arith.addf %223, %224 : vector<8x128xf32>
    %226 = arith.mulf %215, %190 : vector<8x128xf32>
    %227 = arith.mulf %207, %217 : vector<8x128xf32>
    %228 = arith.addf %226, %227 : vector<8x128xf32>
    %229 = math.tanh %228 : vector<8x128xf32>
    %230 = arith.mulf %225, %229 : vector<8x128xf32>
    %231 = vector.shape_cast %230 : vector<8x128xf32> to vector<8x1x128xf32>
    %c0_98 = arith.constant 0 : index
    %c3_99 = arith.constant 3 : index
    %c0_100 = arith.constant 0 : index
    %232 = vector.load %arg6[%c0_98, %c3_99, %c0_100] : memref<8x8x128xf32, #tpu.memory_space<vmem>>, vector<8x1x128xf32>
    tpu.vector_store %arg6[%c0_98, %c3_99, %c0_100], %231 {strides = array<i32>} : memref<8x8x128xf32, #tpu.memory_space<vmem>>, vector<8x1x128xf32>,
    %c4_101 = arith.constant 4 : index
    %c0_102 = arith.constant 0 : index
    %c0_103 = arith.constant 0 : index
    %233 = vector.load %arg7[%c4_101, %c0_102, %c0_103] : memref<8x8x512xf32, #tpu.memory_space<vmem>>, vector<1x8x512xf32>
    %234 = vector.shape_cast %233 : vector<1x8x512xf32> to vector<8x512xf32>
    %235 = arith.truncf %230 : vector<8x128xf32> to vector<8x128xbf16>
    %cst_104 = arith.constant dense<0.000000e+00> : vector<8x512xf32>
    %236 = tpu.matmul %235, %4, %cst_104 {dimension_numbers = #tpu.dot_dimension_numbers<[1], [0], [0], [1], [0, 0, 1, 1], [], []>} : vector<8x128xbf16>, vector<128x512xbf16>, vector<8x512xf32> -> vector<8x512xf32>
    %237 = arith.addf %234, %236 : vector<8x512xf32>
    %238 = vector.extract_strided_slice %237 {offsets = [0, 0], sizes = [8, 128], strides = [1, 1]} : vector<8x512xf32> to vector<8x128xf32>
    %cst_105 = arith.constant 5.000000e-01 : f32
    %239 = vector.broadcast %cst_105 : f32 to vector<8x128xf32>
    %240 = arith.mulf %239, %238 : vector<8x128xf32>
    %241 = math.tanh %240 : vector<8x128xf32>
    %cst_106 = arith.constant 5.000000e-01 : f32
    %242 = vector.broadcast %cst_106 : f32 to vector<8x128xf32>
    %243 = arith.mulf %242, %241 : vector<8x128xf32>
    %cst_107 = arith.constant 5.000000e-01 : f32
    %244 = vector.broadcast %cst_107 : f32 to vector<8x128xf32>
    %245 = arith.addf %243, %244 : vector<8x128xf32>
    %246 = vector.extract_strided_slice %237 {offsets = [0, 128], sizes = [8, 128], strides = [1, 1]} : vector<8x512xf32> to vector<8x128xf32>
    %cst_108 = arith.constant 5.000000e-01 : f32
    %247 = vector.broadcast %cst_108 : f32 to vector<8x128xf32>
    %248 = arith.mulf %247, %246 : vector<8x128xf32>
    %249 = math.tanh %248 : vector<8x128xf32>
    %cst_109 = arith.constant 5.000000e-01 : f32
    %250 = vector.broadcast %cst_109 : f32 to vector<8x128xf32>
    %251 = arith.mulf %250, %249 : vector<8x128xf32>
    %cst_110 = arith.constant 5.000000e-01 : f32
    %252 = vector.broadcast %cst_110 : f32 to vector<8x128xf32>
    %253 = arith.addf %251, %252 : vector<8x128xf32>
    %254 = vector.extract_strided_slice %237 {offsets = [0, 256], sizes = [8, 128], strides = [1, 1]} : vector<8x512xf32> to vector<8x128xf32>
    %255 = math.tanh %254 : vector<8x128xf32>
    %256 = vector.extract_strided_slice %237 {offsets = [0, 384], sizes = [8, 128], strides = [1, 1]} : vector<8x512xf32> to vector<8x128xf32>
    %cst_111 = arith.constant 5.000000e-01 : f32
    %257 = vector.broadcast %cst_111 : f32 to vector<8x128xf32>
    %258 = arith.mulf %257, %256 : vector<8x128xf32>
    %259 = math.tanh %258 : vector<8x128xf32>
    %cst_112 = arith.constant 5.000000e-01 : f32
    %260 = vector.broadcast %cst_112 : f32 to vector<8x128xf32>
    %261 = arith.mulf %260, %259 : vector<8x128xf32>
    %cst_113 = arith.constant 5.000000e-01 : f32
    %262 = vector.broadcast %cst_113 : f32 to vector<8x128xf32>
    %263 = arith.addf %261, %262 : vector<8x128xf32>
    %264 = arith.mulf %253, %228 : vector<8x128xf32>
    %265 = arith.mulf %245, %255 : vector<8x128xf32>
    %266 = arith.addf %264, %265 : vector<8x128xf32>
    %267 = math.tanh %266 : vector<8x128xf32>
    %268 = arith.mulf %263, %267 : vector<8x128xf32>
    %269 = vector.shape_cast %268 : vector<8x128xf32> to vector<8x1x128xf32>
    %c0_114 = arith.constant 0 : index
    %c4_115 = arith.constant 4 : index
    %c0_116 = arith.constant 0 : index
    %270 = vector.load %arg6[%c0_114, %c4_115, %c0_116] : memref<8x8x128xf32, #tpu.memory_space<vmem>>, vector<8x1x128xf32>
    tpu.vector_store %arg6[%c0_114, %c4_115, %c0_116], %269 {strides = array<i32>} : memref<8x8x128xf32, #tpu.memory_space<vmem>>, vector<8x1x128xf32>,
    %c5_117 = arith.constant 5 : index
    %c0_118 = arith.constant 0 : index
    %c0_119 = arith.constant 0 : index
    %271 = vector.load %arg7[%c5_117, %c0_118, %c0_119] : memref<8x8x512xf32, #tpu.memory_space<vmem>>, vector<1x8x512xf32>
    %272 = vector.shape_cast %271 : vector<1x8x512xf32> to vector<8x512xf32>
    %273 = arith.truncf %268 : vector<8x128xf32> to vector<8x128xbf16>
    %cst_120 = arith.constant dense<0.000000e+00> : vector<8x512xf32>
    %274 = tpu.matmul %273, %4, %cst_120 {dimension_numbers = #tpu.dot_dimension_numbers<[1], [0], [0], [1], [0, 0, 1, 1], [], []>} : vector<8x128xbf16>, vector<128x512xbf16>, vector<8x512xf32> -> vector<8x512xf32>
    %275 = arith.addf %272, %274 : vector<8x512xf32>
    %276 = vector.extract_strided_slice %275 {offsets = [0, 0], sizes = [8, 128], strides = [1, 1]} : vector<8x512xf32> to vector<8x128xf32>
    %cst_121 = arith.constant 5.000000e-01 : f32
    %277 = vector.broadcast %cst_121 : f32 to vector<8x128xf32>
    %278 = arith.mulf %277, %276 : vector<8x128xf32>
    %279 = math.tanh %278 : vector<8x128xf32>
    %cst_122 = arith.constant 5.000000e-01 : f32
    %280 = vector.broadcast %cst_122 : f32 to vector<8x128xf32>
    %281 = arith.mulf %280, %279 : vector<8x128xf32>
    %cst_123 = arith.constant 5.000000e-01 : f32
    %282 = vector.broadcast %cst_123 : f32 to vector<8x128xf32>
    %283 = arith.addf %281, %282 : vector<8x128xf32>
    %284 = vector.extract_strided_slice %275 {offsets = [0, 128], sizes = [8, 128], strides = [1, 1]} : vector<8x512xf32> to vector<8x128xf32>
    %cst_124 = arith.constant 5.000000e-01 : f32
    %285 = vector.broadcast %cst_124 : f32 to vector<8x128xf32>
    %286 = arith.mulf %285, %284 : vector<8x128xf32>
    %287 = math.tanh %286 : vector<8x128xf32>
    %cst_125 = arith.constant 5.000000e-01 : f32
    %288 = vector.broadcast %cst_125 : f32 to vector<8x128xf32>
    %289 = arith.mulf %288, %287 : vector<8x128xf32>
    %cst_126 = arith.constant 5.000000e-01 : f32
    %290 = vector.broadcast %cst_126 : f32 to vector<8x128xf32>
    %291 = arith.addf %289, %290 : vector<8x128xf32>
    %292 = vector.extract_strided_slice %275 {offsets = [0, 256], sizes = [8, 128], strides = [1, 1]} : vector<8x512xf32> to vector<8x128xf32>
    %293 = math.tanh %292 : vector<8x128xf32>
    %294 = vector.extract_strided_slice %275 {offsets = [0, 384], sizes = [8, 128], strides = [1, 1]} : vector<8x512xf32> to vector<8x128xf32>
    %cst_127 = arith.constant 5.000000e-01 : f32
    %295 = vector.broadcast %cst_127 : f32 to vector<8x128xf32>
    %296 = arith.mulf %295, %294 : vector<8x128xf32>
    %297 = math.tanh %296 : vector<8x128xf32>
    %cst_128 = arith.constant 5.000000e-01 : f32
    %298 = vector.broadcast %cst_128 : f32 to vector<8x128xf32>
    %299 = arith.mulf %298, %297 : vector<8x128xf32>
    %cst_129 = arith.constant 5.000000e-01 : f32
    %300 = vector.broadcast %cst_129 : f32 to vector<8x128xf32>
    %301 = arith.addf %299, %300 : vector<8x128xf32>
    %302 = arith.mulf %291, %266 : vector<8x128xf32>
    %303 = arith.mulf %283, %293 : vector<8x128xf32>
    %304 = arith.addf %302, %303 : vector<8x128xf32>
    %305 = math.tanh %304 : vector<8x128xf32>
    %306 = arith.mulf %301, %305 : vector<8x128xf32>
    %307 = vector.shape_cast %306 : vector<8x128xf32> to vector<8x1x128xf32>
    %c0_130 = arith.constant 0 : index
    %c5_131 = arith.constant 5 : index
    %c0_132 = arith.constant 0 : index
    %308 = vector.load %arg6[%c0_130, %c5_131, %c0_132] : memref<8x8x128xf32, #tpu.memory_space<vmem>>, vector<8x1x128xf32>
    tpu.vector_store %arg6[%c0_130, %c5_131, %c0_132], %307 {strides = array<i32>} : memref<8x8x128xf32, #tpu.memory_space<vmem>>, vector<8x1x128xf32>,
    %c6_133 = arith.constant 6 : index
    %c0_134 = arith.constant 0 : index
    %c0_135 = arith.constant 0 : index
    %309 = vector.load %arg7[%c6_133, %c0_134, %c0_135] : memref<8x8x512xf32, #tpu.memory_space<vmem>>, vector<1x8x512xf32>
    %310 = vector.shape_cast %309 : vector<1x8x512xf32> to vector<8x512xf32>
    %311 = arith.truncf %306 : vector<8x128xf32> to vector<8x128xbf16>
    %cst_136 = arith.constant dense<0.000000e+00> : vector<8x512xf32>
    %312 = tpu.matmul %311, %4, %cst_136 {dimension_numbers = #tpu.dot_dimension_numbers<[1], [0], [0], [1], [0, 0, 1, 1], [], []>} : vector<8x128xbf16>, vector<128x512xbf16>, vector<8x512xf32> -> vector<8x512xf32>
    %313 = arith.addf %310, %312 : vector<8x512xf32>
    %314 = vector.extract_strided_slice %313 {offsets = [0, 0], sizes = [8, 128], strides = [1, 1]} : vector<8x512xf32> to vector<8x128xf32>
    %cst_137 = arith.constant 5.000000e-01 : f32
    %315 = vector.broadcast %cst_137 : f32 to vector<8x128xf32>
    %316 = arith.mulf %315, %314 : vector<8x128xf32>
    %317 = math.tanh %316 : vector<8x128xf32>
    %cst_138 = arith.constant 5.000000e-01 : f32
    %318 = vector.broadcast %cst_138 : f32 to vector<8x128xf32>
    %319 = arith.mulf %318, %317 : vector<8x128xf32>
    %cst_139 = arith.constant 5.000000e-01 : f32
    %320 = vector.broadcast %cst_139 : f32 to vector<8x128xf32>
    %321 = arith.addf %319, %320 : vector<8x128xf32>
    %322 = vector.extract_strided_slice %313 {offsets = [0, 128], sizes = [8, 128], strides = [1, 1]} : vector<8x512xf32> to vector<8x128xf32>
    %cst_140 = arith.constant 5.000000e-01 : f32
    %323 = vector.broadcast %cst_140 : f32 to vector<8x128xf32>
    %324 = arith.mulf %323, %322 : vector<8x128xf32>
    %325 = math.tanh %324 : vector<8x128xf32>
    %cst_141 = arith.constant 5.000000e-01 : f32
    %326 = vector.broadcast %cst_141 : f32 to vector<8x128xf32>
    %327 = arith.mulf %326, %325 : vector<8x128xf32>
    %cst_142 = arith.constant 5.000000e-01 : f32
    %328 = vector.broadcast %cst_142 : f32 to vector<8x128xf32>
    %329 = arith.addf %327, %328 : vector<8x128xf32>
    %330 = vector.extract_strided_slice %313 {offsets = [0, 256], sizes = [8, 128], strides = [1, 1]} : vector<8x512xf32> to vector<8x128xf32>
    %331 = math.tanh %330 : vector<8x128xf32>
    %332 = vector.extract_strided_slice %313 {offsets = [0, 384], sizes = [8, 128], strides = [1, 1]} : vector<8x512xf32> to vector<8x128xf32>
    %cst_143 = arith.constant 5.000000e-01 : f32
    %333 = vector.broadcast %cst_143 : f32 to vector<8x128xf32>
    %334 = arith.mulf %333, %332 : vector<8x128xf32>
    %335 = math.tanh %334 : vector<8x128xf32>
    %cst_144 = arith.constant 5.000000e-01 : f32
    %336 = vector.broadcast %cst_144 : f32 to vector<8x128xf32>
    %337 = arith.mulf %336, %335 : vector<8x128xf32>
    %cst_145 = arith.constant 5.000000e-01 : f32
    %338 = vector.broadcast %cst_145 : f32 to vector<8x128xf32>
    %339 = arith.addf %337, %338 : vector<8x128xf32>
    %340 = arith.mulf %329, %304 : vector<8x128xf32>
    %341 = arith.mulf %321, %331 : vector<8x128xf32>
    %342 = arith.addf %340, %341 : vector<8x128xf32>
    %343 = math.tanh %342 : vector<8x128xf32>
    %344 = arith.mulf %339, %343 : vector<8x128xf32>
    %345 = vector.shape_cast %344 : vector<8x128xf32> to vector<8x1x128xf32>
    %c0_146 = arith.constant 0 : index
    %c6_147 = arith.constant 6 : index
    %c0_148 = arith.constant 0 : index
    %346 = vector.load %arg6[%c0_146, %c6_147, %c0_148] : memref<8x8x128xf32, #tpu.memory_space<vmem>>, vector<8x1x128xf32>
    tpu.vector_store %arg6[%c0_146, %c6_147, %c0_148], %345 {strides = array<i32>} : memref<8x8x128xf32, #tpu.memory_space<vmem>>, vector<8x1x128xf32>,
    %c7_149 = arith.constant 7 : index
    %c0_150 = arith.constant 0 : index
    %c0_151 = arith.constant 0 : index
    %347 = vector.load %arg7[%c7_149, %c0_150, %c0_151] : memref<8x8x512xf32, #tpu.memory_space<vmem>>, vector<1x8x512xf32>
    %348 = vector.shape_cast %347 : vector<1x8x512xf32> to vector<8x512xf32>
    %349 = arith.truncf %344 : vector<8x128xf32> to vector<8x128xbf16>
    %cst_152 = arith.constant dense<0.000000e+00> : vector<8x512xf32>
    %350 = tpu.matmul %349, %4, %cst_152 {dimension_numbers = #tpu.dot_dimension_numbers<[1], [0], [0], [1], [0, 0, 1, 1], [], []>} : vector<8x128xbf16>, vector<128x512xbf16>, vector<8x512xf32> -> vector<8x512xf32>
    %351 = arith.addf %348, %350 : vector<8x512xf32>
    %352 = vector.extract_strided_slice %351 {offsets = [0, 0], sizes = [8, 128], strides = [1, 1]} : vector<8x512xf32> to vector<8x128xf32>
    %cst_153 = arith.constant 5.000000e-01 : f32
    %353 = vector.broadcast %cst_153 : f32 to vector<8x128xf32>
    %354 = arith.mulf %353, %352 : vector<8x128xf32>
    %355 = math.tanh %354 : vector<8x128xf32>
    %cst_154 = arith.constant 5.000000e-01 : f32
    %356 = vector.broadcast %cst_154 : f32 to vector<8x128xf32>
    %357 = arith.mulf %356, %355 : vector<8x128xf32>
    %cst_155 = arith.constant 5.000000e-01 : f32
    %358 = vector.broadcast %cst_155 : f32 to vector<8x128xf32>
    %359 = arith.addf %357, %358 : vector<8x128xf32>
    %360 = vector.extract_strided_slice %351 {offsets = [0, 128], sizes = [8, 128], strides = [1, 1]} : vector<8x512xf32> to vector<8x128xf32>
    %cst_156 = arith.constant 5.000000e-01 : f32
    %361 = vector.broadcast %cst_156 : f32 to vector<8x128xf32>
    %362 = arith.mulf %361, %360 : vector<8x128xf32>
    %363 = math.tanh %362 : vector<8x128xf32>
    %cst_157 = arith.constant 5.000000e-01 : f32
    %364 = vector.broadcast %cst_157 : f32 to vector<8x128xf32>
    %365 = arith.mulf %364, %363 : vector<8x128xf32>
    %cst_158 = arith.constant 5.000000e-01 : f32
    %366 = vector.broadcast %cst_158 : f32 to vector<8x128xf32>
    %367 = arith.addf %365, %366 : vector<8x128xf32>
    %368 = vector.extract_strided_slice %351 {offsets = [0, 256], sizes = [8, 128], strides = [1, 1]} : vector<8x512xf32> to vector<8x128xf32>
    %369 = math.tanh %368 : vector<8x128xf32>
    %370 = vector.extract_strided_slice %351 {offsets = [0, 384], sizes = [8, 128], strides = [1, 1]} : vector<8x512xf32> to vector<8x128xf32>
    %cst_159 = arith.constant 5.000000e-01 : f32
    %371 = vector.broadcast %cst_159 : f32 to vector<8x128xf32>
    %372 = arith.mulf %371, %370 : vector<8x128xf32>
    %373 = math.tanh %372 : vector<8x128xf32>
    %cst_160 = arith.constant 5.000000e-01 : f32
    %374 = vector.broadcast %cst_160 : f32 to vector<8x128xf32>
    %375 = arith.mulf %374, %373 : vector<8x128xf32>
    %cst_161 = arith.constant 5.000000e-01 : f32
    %376 = vector.broadcast %cst_161 : f32 to vector<8x128xf32>
    %377 = arith.addf %375, %376 : vector<8x128xf32>
    %378 = arith.mulf %367, %342 : vector<8x128xf32>
    %379 = arith.mulf %359, %369 : vector<8x128xf32>
    %380 = arith.addf %378, %379 : vector<8x128xf32>
    %381 = math.tanh %380 : vector<8x128xf32>
    %382 = arith.mulf %377, %381 : vector<8x128xf32>
    %383 = vector.shape_cast %382 : vector<8x128xf32> to vector<8x1x128xf32>
    %c0_162 = arith.constant 0 : index
    %c7_163 = arith.constant 7 : index
    %c0_164 = arith.constant 0 : index
    %384 = vector.load %arg6[%c0_162, %c7_163, %c0_164] : memref<8x8x128xf32, #tpu.memory_space<vmem>>, vector<8x1x128xf32>
    tpu.vector_store %arg6[%c0_162, %c7_163, %c0_164], %383 {strides = array<i32>} : memref<8x8x128xf32, #tpu.memory_space<vmem>>, vector<8x1x128xf32>,
    %c0_165 = arith.constant 0 : index
    %c0_166 = arith.constant 0 : index
    %385 = vector.load %arg8[%c0_165, %c0_166] : memref<8x128xf32, #tpu.memory_space<vmem>>, vector<8x128xf32>
    tpu.vector_store %arg8[%c0_165, %c0_166], %382 {strides = array<i32>} : memref<8x128xf32, #tpu.memory_space<vmem>>, vector<8x128xf32>,
    %c0_167 = arith.constant 0 : index
    %c0_168 = arith.constant 0 : index
    %386 = vector.load %arg9[%c0_167, %c0_168] : memref<8x128xf32, #tpu.memory_space<vmem>>, vector<8x128xf32>
    tpu.vector_store %arg9[%c0_167, %c0_168], %380 {strides = array<i32>} : memref<8x128xf32, #tpu.memory_space<vmem>>, vector<8x128xf32>,
    return
  }
  func.func @transform_0(%arg0: i32, %arg1: i32) -> (i32, i32, i32) {
    %c0_i32 = arith.constant 0 : i32
    %c0_i32_0 = arith.constant 0 : i32
    return %arg0, %arg1, %c0_i32 : i32, i32, i32
  }
  func.func @transform_1(%arg0: i32, %arg1: i32) -> (i32, i32) {
    %c0_i32 = arith.constant 0 : i32
    %c0_i32_0 = arith.constant 0 : i32
    %c0_i32_1 = arith.constant 0 : i32
    return %c0_i32, %c0_i32_0 : i32, i32
  }
  func.func @transform_2(%arg0: i32, %arg1: i32) -> (i32, i32) {
    %c0_i32 = arith.constant 0 : i32
    %c0_i32_0 = arith.constant 0 : i32
    %c0_i32_1 = arith.constant 0 : i32
    return %c0_i32, %c0_i32_0 : i32, i32
  }
  func.func @transform_3(%arg0: i32, %arg1: i32) -> (i32, i32) {
    %c0_i32 = arith.constant 0 : i32
    %c0_i32_0 = arith.constant 0 : i32
    %c0_i32_1 = arith.constant 0 : i32
    return %c0_i32, %c0_i32_0 : i32, i32
  }
  func.func @transform_4(%arg0: i32, %arg1: i32) -> (i32, i32, i32) {
    %c0_i32 = arith.constant 0 : i32
    %c0_i32_0 = arith.constant 0 : i32
    return %arg0, %arg1, %c0_i32 : i32, i32, i32
  }
}

</mosaic_0001>

<bundles_post_ra>
// kernel: lstm_block_forward.1
= control target key start
LH: loop header
LB: loop body
LE: loop exit
PB: predicated region body
PF: predicated region fallthrough
CT: control target
= control target key end

     0   :  { %vm148_vm0 = vcmask 1043456   ;;  %vm113_vm1 = vcmask 1041409   ;;  %v4110_v2 = vmov 0   ;;  %vm116_vm2 = vcmask 1042434   ;;  %s4105_s1 = inlined_call_operand.vmem [shape: bf16[8,512], index: 1, kind: input, shape index: {}]   ;;  %s4106_s0 = inlined_call_operand.vmem [shape: f32[8,8,8], index: 0, kind: input, shape index: {}]   ;;  %s4107_s2 = inlined_call_operand.vmem [shape: bf16[128,512], index: 2, kind: input, shape index: {}]   ;;  %s4108_s3 = inlined_call_operand.vmem [shape: f32[1,512], index: 3, kind: input, shape index: {}]   ;;  %s4109_s4 = inlined_call_operand.vmem [shape: f32[8,8,128], index: 4, kind: output, shape index: {}]  }
   0x1   :  { %v24_v0 = vld [vmem:[%s4105_s1] sm:$0xff]  ;;  %v25_v1 = vld [vmem:[%s4105_s1 + $0x8] sm:$0xff]  ;;  %193 = vmatprep.mubr.bf16.mxu0 %v4110_v2  ;;  %234 = vmatprep.mubr.bf16.mxu1 %v4110_v2  ;;  %vm119_vm3 = vcmask 1043459   ;;  %vm122_vm4 = vcmask 1044484   ;;  %v61_v9 = vld [vmem:[%s4106_s0 + $0x10] sm:$0xff]  ;;  %vm125_vm5 = vcmask 1045509  }
   0x2   :  { %v59_v3 = vld [vmem:[%s4106_s0] sm:$0xff]  ;;  %v2856_v4 = vcombine.high %v24_v0, %v24_v0  ;;  %v2550_v5 = vcombine.low %v24_v0, %v24_v0  ;;  %v2858_v6 = vcombine.high %v25_v1, %v25_v1  ;;  %v2552_v7 = vcombine.low %v25_v1, %v25_v1  ;;  %v60_v8 = vld [vmem:[%s4106_s0 + $0x8] sm:$0xff]  ;;  %v62_v10 = vld [vmem:[%s4106_s0 + $0x18] sm:$0xff] }
   0x3   :  { %v63_v11 = vld [vmem:[%s4106_s0 + $0x20] sm:$0xff]  ;;  %v64_v12 = vld [vmem:[%s4106_s0 + $0x28] sm:$0xff]  ;;  %v65_v13 = vld [vmem:[%s4106_s0 + $0x30] sm:$0xff]  ;;  %v67_v14 = vpack.c.bf16 %v59_v3, %v59_v3  ;;  %v68_v15 = vpack.c.bf16 %v60_v8, %v60_v8  ;;  %v69_v16 = vpack.c.bf16 %v61_v9, %v61_v9  ;;  %v70_v17 = vpack.c.bf16 %v62_v10, %v62_v10 }
   0x4   :  { %2554 = vmatprep.subr.msk.bf16.mxu0 %vm148_vm0, %v2856_v4  ;;  %v2881_v18 = vsel %vm148_vm0, %v2550_v5, 0  ;;  %2556 = vmatprep.subr.msk.bf16.mxu1 %vm148_vm0, %v2858_v6  ;;  %v2886_v19 = vsel %vm148_vm0, %v2552_v7, 0  ;;  %v66_v20 = vld [vmem:[%s4106_s0 + $0x38] sm:$0xff]  ;;  %v71_v21 = vpack.c.bf16 %v63_v11, %v63_v11  ;;  %v72_v22 = vpack.c.bf16 %v64_v12, %v64_v12 }
   0x5   :  { %176 = vmatpush1.bf16.msra.mxu0 %v2881_v18  ;;  %217 = vmatpush1.bf16.msra.mxu1 %v2886_v19  ;;  %v73_v23 = vpack.c.bf16 %v65_v13, %v65_v13  ;;  %v74_v24 = vpack.c.bf16 %v66_v20, %v66_v20  ;;  %v2893_v25 = vunpack.c.l.b16 %v67_v14  ;;  %v2895_v26 = vunpack.c.l.b16 %v68_v15 }
   0x6   :  { %2558 = vmatprep.subr.msk.bf16.mxu0 %vm148_vm0, %v2856_v4  ;;  %v2899_v27 = vunpack.c.l.b16 %v69_v16  ;;  %v2901_v28 = vunpack.c.l.b16 %v70_v17  ;;  %v2903_v29 = vunpack.c.l.b16 %v71_v21  ;;  %v2905_v30 = vunpack.c.l.b16 %v72_v22  ;;  %2560 = vmatprep.subr.msk.bf16.mxu1 %vm148_vm0, %v2858_v6 }
   0x7   :  { %v2909_v31 = vunpack.c.l.b16 %v73_v23  ;;  %v2911_v32 = vunpack.c.l.b16 %v74_v24  ;;  %v112_v33 = vrot.slane %v2895_v26, 7  ;;  %vm128_vm6 = vcmask 1046534  }
   0x8   :  { %v115_v34 = vrot.slane %v2899_v27, 6  ;;  %v118_v35 = vrot.slane %v2901_v28, 5  ;;  %v121_v36 = vrot.slane %v2903_v29, 4  ;;  %v124_v38 = vrot.slane %v2905_v30, 3 }
   0x9   :  { %v114_v37 = vsel %vm113_vm1, %v112_v33, %v2893_v25  ;;  %v127_v39 = vrot.slane %v2909_v31, 2  ;;  %v130_v40 = vrot.slane %v2911_v32, 1  ;;  %vm131_vm7 = vcmask 1047559  }
   0xa   :  { %v117_v41 = vsel %vm116_vm2, %v115_v34, %v114_v37  ;;  %v247_v42 = vrot.slane %v2893_v25, 1  ;;  %v249_v43 = vrot.slane %v2899_v27, 7  ;;  %vm144_vm8 = vcmask 64512  }
   0xb   :  { %v120_v44 = vsel %vm119_vm3, %v118_v35, %v117_v41  ;;  %v251_v45 = vrot.slane %v2901_v28, 6  ;;  %v253_v46 = vrot.slane %v2903_v29, 5  ;;  %v255_v49 = vrot.slane %v2905_v30, 4 }
   0xc   :  { %v123_v47 = vsel %vm122_vm4, %v121_v36, %v120_v44  ;;  %v248_v48 = vsel %vm113_vm1, %v2895_v26, %v247_v42  ;;  %v257_v50 = vrot.slane %v2909_v31, 3  ;;  %v352_v53 = vrot.slane %v2893_v25, 2 }
   0xd   :  { %v126_v51 = vsel %vm125_vm5, %v124_v38, %v123_v47  ;;  %v250_v52 = vsel %vm116_vm2, %v249_v43, %v248_v48  ;;  %v353_v54 = vrot.slane %v2895_v26, 1  ;;  %v356_v57 = vrot.slane %v2901_v28, 7 }
   0xe   :  { %v129_v55 = vsel %vm128_vm6, %v127_v39, %v126_v51  ;;  %v252_v56 = vsel %vm119_vm3, %v251_v45, %v250_v52  ;;  %v358_v58 = vrot.slane %v2903_v29, 6  ;;  %v259_v61 = vrot.slane %v2911_v32, 2 }
   0xf   :  { %v132_v59 = vsel %vm131_vm7, %v130_v40, %v129_v55  ;;  %v254_v60 = vsel %vm122_vm4, %v253_v46, %v252_v56  ;;  %v354_v62 = vsel %vm113_vm1, %v353_v54, %v352_v53  ;;  %v360_v7 = vrot.slane %v2905_v30, 5 }
  0x10   :  { %v133_v63 = vpack.c.b16 %v132_v59, %v132_v59  ;;  %v256_v0 = vsel %vm125_vm5, %v255_v49, %v254_v60  ;;  %v355_v1 = vsel %vm116_vm2, %v2899_v27, %v354_v62  ;;  %v457_v8 = vrot.slane %v2893_v25, 3 }
  0x11   :  { %v258_v3 = vsel %vm128_vm6, %v257_v50, %v256_v0  ;;  %v357_v5 = vsel %vm119_vm3, %v356_v57, %v355_v1  ;;  %v458_v10 = vrot.slane %v2895_v26, 2  ;;  %v460_v11 = vrot.slane %v2899_v27, 1 }
  0x12   :  { %2555 = vmatmul.mubr.msk.bf16.vlgmr.msra.gmra.mxu0 %vm144_vm8, %v133_v63  ;;  %2557 = vmatmul.mubr.msk.bf16.vlgmr.msra.gmra.mxu1 %vm144_vm8, %v133_v63  ;;  %v359_v9 = vsel %vm122_vm4, %v358_v58, %v357_v5  ;;  %v260_v12 = vsel %vm131_vm7, %v259_v61, %v258_v3  ;;  %v362_v13 = vrot.slane %v2909_v31, 4  ;;  %v562_v17 = vrot.slane %v2893_v25, 4 }
  0x13   :  { %280 = vmatpush1.bf16.msra.mxu0 %v2881_v18  ;;  %321 = vmatpush1.bf16.msra.mxu1 %v2886_v19  ;;  %v459_v14 = vsel %vm113_vm1, %v458_v10, %v457_v8  ;;  %v361_v15 = vsel %vm125_vm5, %v360_v7, %v359_v9  ;;  %v563_v20 = vrot.slane %v2895_v26, 3  ;;  %v261_v21 = vpack.c.b16 %v260_v12, %v260_v12 }
  0x14   :  { %297 = vmatprep.mubr.bf16.mxu0 %v4110_v2  ;;  %338 = vmatprep.mubr.bf16.mxu1 %v4110_v2  ;;  %v461_v16 = vsel %vm116_vm2, %v460_v11, %v459_v14  ;;  %v463_v22 = vrot.slane %v2903_v29, 7  ;;  %v364_v23 = vrot.slane %v2911_v32, 3  ;;  %v363_v33 = vsel %vm128_vm6, %v362_v13, %v361_v15 }
  0x15   :  { %2562 = vmatprep.subr.msk.bf16.mxu0 %vm148_vm0, %v2856_v4  ;;  %2564 = vmatprep.subr.msk.bf16.mxu1 %vm148_vm0, %v2858_v6  ;;  %v462_v24 = vsel %vm119_vm3, %v2901_v28, %v461_v16  ;;  %v565_v34 = vrot.slane %v2899_v27, 2  ;;  %v465_v35 = vrot.slane %v2905_v30, 6  ;;  %v564_v36 = vsel %vm113_vm1, %v563_v20, %v562_v17 }
  0x16   :  { %v464_v37 = vsel %vm122_vm4, %v463_v22, %v462_v24  ;;  %v365_v38 = vsel %vm131_vm7, %v364_v23, %v363_v33  ;;  %v567_v39 = vrot.slane %v2901_v28, 1  ;;  %v467_v40 = vrot.slane %v2909_v31, 5 }
  0x17   :  { %v566_v41 = vsel %vm116_vm2, %v565_v34, %v564_v36  ;;  %v466_v42 = vsel %vm125_vm5, %v465_v35, %v464_v37  ;;  %v667_v43 = vrot.slane %v2893_v25, 5  ;;  %v668_v44 = vrot.slane %v2895_v26, 4 }
  0x18   :  { %v366_v45 = vpack.c.b16 %v365_v38, %v365_v38  ;;  %v469_v46 = vrot.slane %v2911_v32, 4  ;;  %v568_v47 = vsel %vm119_vm3, %v567_v39, %v566_v41  ;;  %v468_v48 = vsel %vm128_vm6, %v467_v40, %v466_v42 }
  0x19   :  { %v670_v49 = vrot.slane %v2899_v27, 3  ;;  %v570_v50 = vrot.slane %v2905_v30, 7  ;;  %v669_v51 = vsel %vm113_vm1, %v668_v44, %v667_v43  ;;  %v569_v52 = vsel %vm122_vm4, %v2903_v29, %v568_v47  ;;  %v3094_v43 = vld [vmem:[%s4107_s2 + $0xe4] ss:$16 sps:$4 sm:$0xff]   ;;  %v3114_v44 = vld [vmem:[%s4107_s2 + $0xe0] ss:$16 sps:$4 sm:$0xff]  }
  0x1a   :  { %2559 = vmatmul.mubr.msk.bf16.vlgmr.msra.gmra.mxu0 %vm144_vm8, %v261_v21  ;;  %2561 = vmatmul.mubr.msk.bf16.vlgmr.msra.gmra.mxu1 %vm144_vm8, %v261_v21  ;;  %v470_v53 = vsel %vm131_vm7, %v469_v46, %v468_v48  ;;  %v672_v54 = vrot.slane %v2901_v28, 2  ;;  %v572_v55 = vrot.slane %v2909_v31, 6  ;;  %v772_v58 = vrot.slane %v2893_v25, 6  ;;  %v3143_v46 = vld [vmem:[%s4107_s2 + $0xc8] ss:$16 sps:$4 sm:$0xff]  }
  0x1b   :  { %385 = vmatpush1.bf16.msra.mxu0 %v2881_v18  ;;  %426 = vmatpush1.bf16.msra.mxu1 %v2886_v19  ;;  %v671_v56 = vsel %vm116_vm2, %v670_v49, %v669_v51  ;;  %v571_v57 = vsel %vm125_vm5, %v570_v50, %v569_v52  ;;  %v773_v59 = vrot.slane %v2895_v26, 5  ;;  %v471_v60 = vpack.c.b16 %v470_v53, %v470_v53  ;;  %v3150_v47 = vld [vmem:[%s4107_s2 + $0xa4] ss:$16 sps:$4 sm:$0xff]   ;;  %v3155_v48 = vld [vmem:[%s4107_s2 + $0xac] ss:$16 sps:$4 sm:$0xff]  }
  0x1c   :  { %402 = vmatprep.mubr.bf16.mxu0 %v4110_v2  ;;  %443 = vmatprep.mubr.bf16.mxu1 %v4110_v2  ;;  %v674_v61 = vrot.slane %v2903_v29, 1  ;;  %v574_v62 = vrot.slane %v2911_v32, 5  ;;  %v673_v63 = vsel %vm119_vm3, %v672_v54, %v671_v56  ;;  %v573_v0 = vsel %vm128_vm6, %v572_v55, %v571_v57  ;;  %v3164_v49 = vld [vmem:[%s4107_s2 + $0xa0] ss:$16 sps:$4 sm:$0xff]   ;;  %v3169_v50 = vld [vmem:[%s4107_s2 + $0xa8] ss:$16 sps:$4 sm:$0xff]  }
  0x1d   :  { %2566 = vmatprep.subr.msk.bf16.mxu0 %vm148_vm0, %v2856_v4  ;;  %2568 = vmatprep.subr.msk.bf16.mxu1 %vm148_vm0, %v2858_v6  ;;  %v775_v1 = vrot.slane %v2899_v27, 4  ;;  %v774_v3 = vsel %vm113_vm1, %v773_v59, %v772_v58  ;;  %v777_v8 = vrot.slane %v2901_v28, 3  ;;  %v677_v9 = vrot.slane %v2909_v31, 7  ;;  %v3176_v51 = vld [vmem:[%s4107_s2 + $0x84] ss:$16 sps:$4 sm:$0xff]  }
  0x1e   :  { %v675_v5 = vsel %vm122_vm4, %v674_v61, %v673_v63  ;;  %v575_v7 = vsel %vm131_vm7, %v574_v62, %v573_v0  ;;  %v877_v12 = vrot.slane %v2893_v25, 7  ;;  %v878_v13 = vrot.slane %v2895_v26, 6  ;;  %v3181_v52 = vld [vmem:[%s4107_s2 + $0x8c] ss:$16 sps:$4 sm:$0xff]   ;;  %v3188_v53 = vld [vmem:[%s4107_s2 + $0x80] ss:$16 sps:$4 sm:$0xff]  }
  0x1f   :  { %v776_v10 = vsel %vm116_vm2, %v775_v1, %v774_v3  ;;  %v676_v11 = vsel %vm125_vm5, %v2905_v30, %v675_v5  ;;  %v576_v14 = vpack.c.b16 %v575_v7, %v575_v7  ;;  %v779_v15 = vrot.slane %v2903_v29, 2  ;;  %v3193_v54 = vld [vmem:[%s4107_s2 + $0x88] ss:$16 sps:$4 sm:$0xff]   ;;  %v3200_v55 = vld [vmem:[%s4107_s2 + $0x64] ss:$16 sps:$4 sm:$0xff]  }
  0x20   :  { %v679_v16 = vrot.slane %v2911_v32, 6  ;;  %v778_v17 = vsel %vm119_vm3, %v777_v8, %v776_v10  ;;  %v678_v20 = vsel %vm128_vm6, %v677_v9, %v676_v11  ;;  %v880_v21 = vrot.slane %v2899_v27, 5  ;;  %v3205_v56 = vld [vmem:[%s4107_s2 + $0x6c] ss:$16 sps:$4 sm:$0xff]   ;;  %v3212_v57 = vld [vmem:[%s4107_s2 + $0x60] ss:$16 sps:$4 sm:$0xff]  }
  0x21   :  { %v781_v22 = vrot.slane %v2905_v30, 1  ;;  %v879_v23 = vsel %vm113_vm1, %v878_v13, %v877_v12  ;;  %v780_v25 = vsel %vm122_vm4, %v779_v15, %v778_v17  ;;  %v882_v24 = vrot.slane %v2901_v28, 4  ;;  %v3217_v58 = vld [vmem:[%s4107_s2 + $0x68] ss:$16 sps:$4 sm:$0xff]   ;;  %v3224_v59 = vld [vmem:[%s4107_s2 + $0x44] ss:$16 sps:$4 sm:$0xff]  }
  0x22   :  { %2563 = vmatmul.mubr.msk.bf16.vlgmr.msra.gmra.mxu0 %vm144_vm8, %v366_v45  ;;  %2565 = vmatmul.mubr.msk.bf16.vlgmr.msra.gmra.mxu1 %vm144_vm8, %v366_v45  ;;  %v680_v26 = vsel %vm131_vm7, %v679_v16, %v678_v20  ;;  %v881_v27 = vsel %vm116_vm2, %v880_v21, %v879_v23  ;;  %v884_v35 = vrot.slane %v2903_v29, 3  ;;  %v784_v36 = vrot.slane %v2911_v32, 7  ;;  %v3138_v45 = vld [vmem:[%s4107_s2 + $0xc0] ss:$16 sps:$4 sm:$0xff]   ;;  %v3241_v62 = vld [vmem:[%s4107_s2 + $0x48] ss:$16 sps:$4 sm:$0xff]  }
  0x23   :  { %490 = vmatpush1.bf16.msra.mxu0 %v2881_v18  ;;  %531 = vmatpush1.bf16.msra.mxu1 %v2886_v19  ;;  %v782_v33 = vsel %vm125_vm5, %v781_v22, %v780_v25  ;;  %v681_v34 = vpack.c.b16 %v680_v26, %v680_v26  ;;  %v883_v28 = vsel %vm119_vm3, %v882_v24, %v881_v27  ;;  %v886_v38 = vrot.slane %v2905_v30, 2  ;;  %v3236_v61 = vld [vmem:[%s4107_s2 + $0x40] ss:$16 sps:$4 sm:$0xff]   ;;  %v3248_v63 = vld [vmem:[%s4107_s2 + $0x24] ss:$16 sps:$4 sm:$0xff]  }
  0x24   :  { %507 = vmatprep.mubr.bf16.mxu0 %v4110_v2  ;;  %548 = vmatprep.mubr.bf16.mxu1 %v4110_v2  ;;  %v783_v37 = vsel %vm128_vm6, %v2909_v31, %v782_v33  ;;  %v885_v39 = vsel %vm122_vm4, %v884_v35, %v883_v28  ;;  %v888_v40 = vrot.slane %v2909_v31, 1  ;;  %v3099_v31 = vld [vmem:[%s4107_s2 + $0xec] ss:$16 sps:$4 sm:$0xff]   ;;  %v3260_v1 = vld [vmem:[%s4107_s2 + $0x20] ss:$16 sps:$4 sm:$0xff]   ;;  %v2818_v10 = vmov 0.0|0.0  }
  0x25   :  { %2570 = vmatprep.subr.msk.bf16.mxu0 %vm148_vm0, %v2856_v4  ;;  %2572 = vmatprep.subr.msk.bf16.mxu1 %vm148_vm0, %v2858_v6  ;;  %v785_v29 = vsel %vm131_vm7, %v784_v36, %v783_v37  ;;  %v887_v30 = vsel %vm125_vm5, %v886_v38, %v885_v39  ;;  %v3253_v0 = vld [vmem:[%s4107_s2 + $0x2c] ss:$16 sps:$4 sm:$0xff]   ;;  %v3265_v3 = vld [vmem:[%s4107_s2 + $0x28] ss:$16 sps:$4 sm:$0xff]   ;;  %v3272_v5 = vld [vmem:[%s4107_s2 + $0x4] ss:$16 sps:$4 sm:$0xff]   ;;  %v76_v11 = vlaneseq }
  0x26   :  { %v786_v41 = vpack.c.b16 %v785_v29, %v785_v29  ;;  %v889_v42 = vsel %vm128_vm6, %v888_v40, %v887_v30  ;;  %v3277_v7 = vld [vmem:[%s4107_s2 + $0xc] ss:$16 sps:$4 sm:$0xff]   ;;  %v3284_v8 = vld [vmem:[%s4107_s2] ss:$16 sps:$4 sm:$0xff]   ;;  %v3289_v9 = vld [vmem:[%s4107_s2 + $0x8] ss:$16 sps:$4 sm:$0xff]  }
  0x27   :  { %v3331_v12 = vshrl.u32 %v76_v11, 7  ;;  %v58_v21 = vld [vmem:[%s4108_s3] sm:$0xf] }
  0x29   :  { %v78_v17 = vsub.s32 0, %v3331_v12  ;;  %v86_v20 = vsub.s32 2, %v3331_v12  ;;  %v82_v25 = vsub.s32 1, %v3331_v12  ;;  %v90_v26 = vsub.s32 3, %v3331_v12 }
  0x2a   :  { %2567 = vmatmul.mubr.msk.bf16.vlgmr.msra.gmra.mxu0 %vm144_vm8, %v471_v60  ;;  %2569 = vmatmul.mubr.msk.bf16.vlgmr.msra.gmra.mxu1 %vm144_vm8, %v471_v60  ;;  %v3229_v60 = vld [vmem:[%s4107_s2 + $0x4c] ss:$16 sps:$4 sm:$0xff]  }
  0x2b   :  { %595 = vmatpush1.bf16.msra.mxu0 %v2881_v18  ;;  %636 = vmatpush1.bf16.msra.mxu1 %v2886_v19  ;;  %v3348_v33 = vrot.slane %v58_v21, %v78_v17  ;;  %v3352_v28 = vrot.slane %v58_v21, %v82_v25  ;;  %v3354_v37 = vrot.slane %v58_v21, %v90_v26 }
  0x2c   :  { %612 = vmatprep.mubr.bf16.mxu0 %v4110_v2  ;;  %653 = vmatprep.mubr.bf16.mxu1 %v4110_v2 }
  0x2d   :  { %2574 = vmatprep.subr.msk.bf16.mxu0 %vm148_vm0, %v2856_v4  ;;  %2576 = vmatprep.subr.msk.bf16.mxu1 %vm148_vm0, %v2858_v6 }
  0x32   :  { %2571 = vmatmul.mubr.msk.bf16.vlgmr.msra.gmra.mxu0 %vm144_vm8, %v576_v14  ;;  %2573 = vmatmul.mubr.msk.bf16.vlgmr.msra.gmra.mxu1 %vm144_vm8, %v576_v14 }
  0x33   :  { %700 = vmatpush1.bf16.msra.mxu0 %v2881_v18  ;;  %741 = vmatpush1.bf16.msra.mxu1 %v2886_v19 }
  0x34   :  { %717 = vmatprep.mubr.bf16.mxu0 %v4110_v2  ;;  %758 = vmatprep.mubr.bf16.mxu1 %v4110_v2 }
  0x35   :  { %2578 = vmatprep.subr.msk.bf16.mxu0 %vm148_vm0, %v2856_v4  ;;  %2580 = vmatprep.subr.msk.bf16.mxu1 %vm148_vm0, %v2858_v6 }
  0x3a   :  { %2575 = vmatmul.mubr.msk.bf16.vlgmr.msra.gmra.mxu0 %vm144_vm8, %v681_v34  ;;  %2577 = vmatmul.mubr.msk.bf16.vlgmr.msra.gmra.mxu1 %vm144_vm8, %v681_v34  ;;  %v3350_v34 = vrot.slane %v58_v21, %v86_v20 }
  0x3b   :  { %805 = vmatpush1.bf16.msra.mxu0 %v2881_v18  ;;  %846 = vmatpush1.bf16.msra.mxu1 %v2886_v19 }
  0x3c   :  { %822 = vmatprep.mubr.bf16.mxu0 %v4110_v2  ;;  %863 = vmatprep.mubr.bf16.mxu1 %v4110_v2 }
  0x3d   :  { %2582 = vmatprep.subr.msk.bf16.mxu0 %vm148_vm0, %v2856_v4  ;;  %2584 = vmatprep.subr.msk.bf16.mxu1 %vm148_vm0, %v2858_v6  ;;  %v890_v4 = vsel %vm131_vm7, %v2911_v32, %v889_v42  ;;  %v3129_v32 = vld [vmem:[%s4107_s2 + $0xcc] ss:$16 sps:$4 sm:$0xff]  }
  0x3e   :  { %v891_v6 = vpack.c.b16 %v890_v4, %v890_v4 }
  0x42   :  { %2579 = vmatmul.mubr.msk.bf16.vlgmr.msra.gmra.mxu0 %vm144_vm8, %v786_v41  ;;  %2581 = vmatmul.mubr.msk.bf16.vlgmr.msra.gmra.mxu1 %vm144_vm8, %v786_v41 }
  0x43   :  { %910 = vmatpush1.bf16.msra.mxu0 %v2881_v18  ;;  %951 = vmatpush1.bf16.msra.mxu1 %v2886_v19  ;;  %v3119_v18 = vld [vmem:[%s4107_s2 + $0xe8] ss:$16 sps:$4 sm:$0xff]   ;;  %v3124_v19 = vld [vmem:[%s4107_s2 + $0xc4] ss:$16 sps:$4 sm:$0xff]  }
  0x44   :  { %927 = vmatprep.mubr.bf16.mxu0 %v4110_v2  ;;  %968 = vmatprep.mubr.bf16.mxu1 %v4110_v2 }
  0x45   :  { %1149 = vmatprep.subr.bf16.mxu0 %v3094_v43  ;;  %1190 = vmatprep.subr.bf16.mxu1 %v3099_v31 }
  0x4a   :  { %2583 = vmatmul.mubr.msk.bf16.vlgmr.msra.gmra.mxu0 %vm144_vm8, %v891_v6  ;;  %2585 = vmatmul.mubr.msk.bf16.vlgmr.msra.gmra.mxu1 %vm144_vm8, %v891_v6 }
  0x4b   :  { %1150 = vmatpush1.bf16.msra.mxu0 %v3114_v44  ;;  %1191 = vmatpush1.bf16.msra.mxu1 %v3119_v18 }
  0x4c   :  { %1151 = vmatprep.subr.bf16.mxu0 %v3124_v19  ;;  %1192 = vmatprep.subr.bf16.mxu1 %v3129_v32 }
  0x4d   :  { %1181 = vmatprep.mubr.bf16.mxu0 %v4110_v2  ;;  %1222 = vmatprep.mubr.bf16.mxu1 %v4110_v2 }
  0x4f   :  { %1152 = vmatpush1.bf16.msra.mxu0 %v3138_v45  ;;  %1193 = vmatpush1.bf16.msra.mxu1 %v3143_v46 }
  0x50   :  { %1153 = vmatprep.subr.bf16.mxu0 %v3150_v47  ;;  %1194 = vmatprep.subr.bf16.mxu1 %v3155_v48 }
  0x53   :  { %1154 = vmatpush1.bf16.msra.mxu0 %v3164_v49  ;;  %1195 = vmatpush1.bf16.msra.mxu1 %v3169_v50 }
  0x54   :  { %1155 = vmatprep.subr.bf16.mxu0 %v3176_v51  ;;  %1196 = vmatprep.subr.bf16.mxu1 %v3181_v52 }
  0x57   :  { %1156 = vmatpush1.bf16.msra.mxu0 %v3188_v53  ;;  %1197 = vmatpush1.bf16.msra.mxu1 %v3193_v54 }
  0x58   :  { %1157 = vmatprep.subr.bf16.mxu0 %v3200_v55  ;;  %1198 = vmatprep.subr.bf16.mxu1 %v3205_v56 }
  0x5b   :  { %1158 = vmatpush1.bf16.msra.mxu0 %v3212_v57  ;;  %1199 = vmatpush1.bf16.msra.mxu1 %v3217_v58 }
  0x5c   :  { %1159 = vmatprep.subr.bf16.mxu0 %v3224_v59  ;;  %1200 = vmatprep.subr.bf16.mxu1 %v3229_v60 }
  0x5f   :  { %1160 = vmatpush1.bf16.msra.mxu0 %v3236_v61  ;;  %1201 = vmatpush1.bf16.msra.mxu1 %v3241_v62 }
  0x60   :  { %1161 = vmatprep.subr.bf16.mxu0 %v3248_v63  ;;  %1202 = vmatprep.subr.bf16.mxu1 %v3253_v0 }
  0x63   :  { %1162 = vmatpush1.bf16.msra.mxu0 %v3260_v1  ;;  %1203 = vmatpush1.bf16.msra.mxu1 %v3265_v3 }
  0x64   :  { %1163 = vmatprep.subr.bf16.mxu0 %v3272_v5  ;;  %1204 = vmatprep.subr.bf16.mxu1 %v3277_v7 }
  0x67   :  { %1164 = vmatpush1.bf16.msra.mxu0 %v3284_v8  ;;  %1205 = vmatpush1.bf16.msra.mxu1 %v3289_v9 }
  0x68   :  { %1324 = vmatprep.subr.bf16.mxu0 %v3094_v43  ;;  %1365 = vmatprep.subr.bf16.mxu1 %v3099_v31 }
  0x6a   :  { %1182 = vmatmul.mubr.bf16.vlgmr.msra.gmra.mxu0 %v2818_v10  ;;  %1223 = vmatmul.mubr.bf16.vlgmr.msra.gmra.mxu1 %v2818_v10 }
  0x6b   :  { %1325 = vmatpush1.bf16.msra.mxu0 %v3114_v44  ;;  %1366 = vmatpush1.bf16.msra.mxu1 %v3119_v18 }
  0x6c   :  { %1326 = vmatprep.subr.bf16.mxu0 %v3124_v19  ;;  %1367 = vmatprep.subr.bf16.mxu1 %v3129_v32 }
  0x6d   :  { %1356 = vmatprep.mubr.bf16.mxu0 %v4110_v2  ;;  %1397 = vmatprep.mubr.bf16.mxu1 %v4110_v2 }
  0x6f   :  { %1327 = vmatpush1.bf16.msra.mxu0 %v3138_v45  ;;  %1368 = vmatpush1.bf16.msra.mxu1 %v3143_v46 }
  0x70   :  { %1328 = vmatprep.subr.bf16.mxu0 %v3150_v47  ;;  %1369 = vmatprep.subr.bf16.mxu1 %v3155_v48 }
  0x73   :  { %1329 = vmatpush1.bf16.msra.mxu0 %v3164_v49  ;;  %1370 = vmatpush1.bf16.msra.mxu1 %v3169_v50 }
  0x74   :  { %1330 = vmatprep.subr.bf16.mxu0 %v3176_v51  ;;  %1371 = vmatprep.subr.bf16.mxu1 %v3181_v52 }
  0x77   :  { %1331 = vmatpush1.bf16.msra.mxu0 %v3188_v53  ;;  %1372 = vmatpush1.bf16.msra.mxu1 %v3193_v54 }
  0x78   :  { %1332 = vmatprep.subr.bf16.mxu0 %v3200_v55  ;;  %1373 = vmatprep.subr.bf16.mxu1 %v3205_v56 }
  0x7b   :  { %1333 = vmatpush1.bf16.msra.mxu0 %v3212_v57  ;;  %1374 = vmatpush1.bf16.msra.mxu1 %v3217_v58 }
  0x7c   :  { %1334 = vmatprep.subr.bf16.mxu0 %v3224_v59  ;;  %1375 = vmatprep.subr.bf16.mxu1 %v3229_v60 }
  0x7f   :  { %1335 = vmatpush1.bf16.msra.mxu0 %v3236_v61  ;;  %1376 = vmatpush1.bf16.msra.mxu1 %v3241_v62 }
  0x80   :  { %1336 = vmatprep.subr.bf16.mxu0 %v3248_v63  ;;  %1377 = vmatprep.subr.bf16.mxu1 %v3253_v0 }
  0x83   :  { %1337 = vmatpush1.bf16.msra.mxu0 %v3260_v1  ;;  %1378 = vmatpush1.bf16.msra.mxu1 %v3265_v3 }
  0x84   :  { %1338 = vmatprep.subr.bf16.mxu0 %v3272_v5  ;;  %1379 = vmatprep.subr.bf16.mxu1 %v3277_v7 }
  0x87   :  { %1339 = vmatpush1.bf16.msra.mxu0 %v3284_v8  ;;  %1380 = vmatpush1.bf16.msra.mxu1 %v3289_v9 }
  0x88   :  { %1499 = vmatprep.subr.bf16.mxu0 %v3094_v43  ;;  %1540 = vmatprep.subr.bf16.mxu1 %v3099_v31 }
  0xd2   :  { %v3333_v13 = vpop.f32.mrf.mxu0  ;;  %v3335_v14 = vpop.f32.mrf.mxu1 }
  0xd4   :  { %v3337_v15 = vpop.f32.mrf.mxu0  ;;  %v3339_v16 = vpop.f32.mrf.mxu1 }
  0xd6   :  { %v199_v22 = vpop.f32.mrf.mxu0  ;;  %v240_v23 = vpop.f32.mrf.mxu1 }
  0xd8   :  { %v200_v24 = vpop.f32.mrf.mxu0  ;;  %v241_v27 = vpop.f32.mrf.mxu1 }
  0xda   :  { %v299_v35 = vpop.f32.mrf.mxu0  ;;  %v340_v36 = vpop.f32.mrf.mxu1 }
  0xdb   :  { %v3357_v38 = vadd.f32 %v299_v35, %v3348_v33  ;;  %v3360_v39 = vadd.f32 %v340_v36, %v3350_v34 }
  0xdc   :  { %v301_v29 = vpop.f32.mrf.mxu0  ;;  %v342_v40 = vpop.f32.mrf.mxu1 }
  0xdd   :  { %v3363_v30 = vadd.f32 %v301_v29, %v3352_v28  ;;  %v3366_v41 = vadd.f32 %v342_v40, %v3354_v37 }
  0xde   :  { %v303_v42 = vpop.f32.mrf.mxu0  ;;  %v344_v4 = vpop.f32.mrf.mxu1 }
  0xe0   :  { %v304_v6 = vpop.f32.mrf.mxu0  ;;  %v345_v10 = vpop.f32.mrf.mxu1 }
  0xe2   :  { %v404_v11 = vpop.f32.mrf.mxu0  ;;  %v445_v17 = vpop.f32.mrf.mxu1 }
  0xe3   :  { %v3369_v20 = vadd.f32 %v404_v11, %v3348_v33  ;;  %v3372_v21 = vadd.f32 %v445_v17, %v3350_v34 }
  0xe4   :  { %v406_v22 = vpop.f32.mrf.mxu0  ;;  %v447_v23 = vpop.f32.mrf.mxu1 }
  0xe5   :  { %v3375_v25 = vadd.f32 %v406_v22, %v3352_v28  ;;  %v3378_v26 = vadd.f32 %v447_v23, %v3354_v37 }
  0xe6   :  { %v408_v24 = vpop.f32.mrf.mxu0  ;;  %v449_v27 = vpop.f32.mrf.mxu1 }
  0xe7   :  { %4112 = vst [vmem:[#allocation5_spill] sm:$0xff] %v3378_v26 }
  0xe8   :  { %v409_v35 = vpop.f32.mrf.mxu0  ;;  %v450_v36 = vpop.f32.mrf.mxu1 }
  0xea   :  { %v509_v29 = vpop.f32.mrf.mxu0  ;;  %v550_v40 = vpop.f32.mrf.mxu1 }
  0xeb   :  { %v3381_v42 = vadd.f32 %v509_v29, %v3348_v33  ;;  %v3384_v4 = vadd.f32 %v550_v40, %v3350_v34 }
  0xec   :  { %v511_v6 = vpop.f32.mrf.mxu0  ;;  %v552_v10 = vpop.f32.mrf.mxu1 }
  0xed   :  { %4113 = vst [vmem:[#allocation6_spill] sm:$0xff] %v3381_v42  ;;  %4114 = vst [vmem:[#allocation7_spill] sm:$0xff] %v3384_v4  ;;  %v3387_v11 = vadd.f32 %v511_v6, %v3352_v28  ;;  %v3390_v17 = vadd.f32 %v552_v10, %v3354_v37 }
  0xee   :  { %v513_v22 = vpop.f32.mrf.mxu0  ;;  %v554_v23 = vpop.f32.mrf.mxu1 }
  0xef   :  { %4115 = vst [vmem:[#allocation8_spill] sm:$0xff] %v3387_v11  ;;  %4116 = vst [vmem:[#allocation9_spill] sm:$0xff] %v3390_v17 }
  0xf0   :  { %v514_v24 = vpop.f32.mrf.mxu0  ;;  %v555_v27 = vpop.f32.mrf.mxu1 }
  0xf2   :  { %v614_v35 = vpop.f32.mrf.mxu0  ;;  %v655_v36 = vpop.f32.mrf.mxu1 }
  0xf3   :  { %v3393_v29 = vadd.f32 %v614_v35, %v3348_v33  ;;  %v3396_v40 = vadd.f32 %v655_v36, %v3350_v34 }
  0xf4   :  { %v616_v2 = vpop.f32.mrf.mxu0  ;;  %v657_v4 = vpop.f32.mrf.mxu1 }
  0xf5   :  { %4117 = vst [vmem:[#allocation10_spill] sm:$0xff] %v3393_v29  ;;  %4118 = vst [vmem:[#allocation11_spill] sm:$0xff] %v3396_v40  ;;  %v3399_v6 = vadd.f32 %v616_v2, %v3352_v28  ;;  %v3402_v10 = vadd.f32 %v657_v4, %v3354_v37 }
  0xf6   :  { %v618_v22 = vpop.f32.mrf.mxu0  ;;  %v659_v23 = vpop.f32.mrf.mxu1 }
  0xf7   :  { %4119 = vst [vmem:[#allocation12_spill] sm:$0xff] %v3399_v6  ;;  %4120 = vst [vmem:[#allocation13_spill] sm:$0xff] %v3402_v10 }
  0xf8   :  { %v619_v24 = vpop.f32.mrf.mxu0  ;;  %v660_v27 = vpop.f32.mrf.mxu1 }
  0xfa   :  { %v719_v17 = vpop.f32.mrf.mxu0  ;;  %v760_v11 = vpop.f32.mrf.mxu1 }
  0xfb   :  { %v3405_v35 = vadd.f32 %v719_v17, %v3348_v33  ;;  %v3408_v36 = vadd.f32 %v760_v11, %v3350_v34 }
  0xfc   :  { %v721_v40 = vpop.f32.mrf.mxu0  ;;  %v762_v29 = vpop.f32.mrf.mxu1 }
  0xfd   :  { %4121 = vst [vmem:[#allocation14_spill] sm:$0xff] %v3405_v35  ;;  %4122 = vst [vmem:[#allocation15_spill] sm:$0xff] %v3408_v36  ;;  %v3411_v2 = vadd.f32 %v721_v40, %v3352_v28  ;;  %v3414_v4 = vadd.f32 %v762_v29, %v3354_v37 }
  0xfe   :  { %v723_v22 = vpop.f32.mrf.mxu0  ;;  %v764_v23 = vpop.f32.mrf.mxu1 }
  0xff   :  { %4123 = vst [vmem:[#allocation16_spill] sm:$0xff] %v3411_v2  ;;  %4124 = vst [vmem:[#allocation17_spill] sm:$0xff] %v3414_v4 }
 0x100   :  { %v724_v24 = vpop.f32.mrf.mxu0  ;;  %v765_v27 = vpop.f32.mrf.mxu1 }
 0x102   :  { %v824_v10 = vpop.f32.mrf.mxu0  ;;  %v865_v6 = vpop.f32.mrf.mxu1 }
 0x103   :  { %v3417_v17 = vadd.f32 %v824_v10, %v3348_v33  ;;  %v3420_v11 = vadd.f32 %v865_v6, %v3350_v34 }
 0x104   :  { %v826_v36 = vpop.f32.mrf.mxu0  ;;  %v867_v35 = vpop.f32.mrf.mxu1 }
 0x105   :  { %4125 = vst [vmem:[#allocation18_spill] sm:$0xff] %v3417_v17  ;;  %4126 = vst [vmem:[#allocation19_spill] sm:$0xff] %v3420_v11  ;;  %v3423_v40 = vadd.f32 %v826_v36, %v3352_v28  ;;  %v3426_v29 = vadd.f32 %v867_v35, %v3354_v37 }
 0x106   :  { %v828_v22 = vpop.f32.mrf.mxu0  ;;  %v869_v23 = vpop.f32.mrf.mxu1 }
 0x107   :  { %4127 = vst [vmem:[#allocation20_spill] sm:$0xff] %v3423_v40  ;;  %4128 = vst [vmem:[#allocation21_spill] sm:$0xff] %v3426_v29  ;;  %v196_v29 = vadd.f32 %v3333_v13, %v3348_v33 }
 0x108   :  { %v829_v24 = vpop.f32.mrf.mxu0  ;;  %v870_v27 = vpop.f32.mrf.mxu1 }
 0x10a   :  { %v929_v4 = vpop.f32.mrf.mxu0  ;;  %v970_v2 = vpop.f32.mrf.mxu1 }
 0x10b   :  { %v3429_v10 = vadd.f32 %v929_v4, %v3348_v33  ;;  %v3432_v6 = vadd.f32 %v970_v2, %v3350_v34  ;;  %v198_v2 = vadd.f32 %v3337_v15, %v3352_v28  ;;  %v239_v15 = vadd.f32 %v3339_v16, %v3354_v37 }
 0x10c   :  { %v931_v11 = vpop.f32.mrf.mxu0  ;;  %v972_v17 = vpop.f32.mrf.mxu1 }
 0x10d   :  { %4129 = vst [vmem:[#allocation22_spill] sm:$0xff] %v3429_v10  ;;  %4130 = vst [vmem:[#allocation23_spill] sm:$0xff] %v3432_v6  ;;  %v3435_v36 = vadd.f32 %v931_v11, %v3352_v28  ;;  %v3438_v35 = vadd.f32 %v972_v17, %v3354_v37  ;;  %v237_v11 = vadd.f32 %v3335_v14, %v3350_v34 }
 0x10e   :  { %v933_v22 = vpop.f32.mrf.mxu0  ;;  %v974_v23 = vpop.f32.mrf.mxu1 }
 0x10f   :  { %4131 = vst [vmem:[#allocation24_spill] sm:$0xff] %v3435_v36  ;;  %4132 = vst [vmem:[#allocation25_spill] sm:$0xff] %v3438_v35 }
 0x110   :  { %v934_v24 = vpop.f32.mrf.mxu0  ;;  %v975_v27 = vpop.f32.mrf.mxu1 }
 0x12a   :  { %v1183_v4 = vpop.f32.mrf.mxu0  ;;  %v1224_v10 = vpop.f32.mrf.mxu1 }
 0x12b   :  { %v1231_v6 = vadd.f32 %v1183_v4, %v196_v29  ;;  %v1233_v24 = vadd.f32 %v1224_v10, %v237_v11 }
 0x12c   :  { %v1185_v40 = vpop.f32.mrf.mxu0  ;;  %v1226_v42 = vpop.f32.mrf.mxu1 }
 0x12d   :  { %v1235_v17 = vmul.f32 0.5, %v1231_v6  ;;  %v1232_v35 = vadd.f32 %v1185_v40, %v198_v2  ;;  %v1234_v33 = vadd.f32 %v1226_v42, %v239_v15 }
 0x12e   :  { %v1187_v22 = vpop.f32.mrf.mxu0  ;;  %v1228_v23 = vpop.f32.mrf.mxu1 }
 0x12f   :  { %2705 = vtanh.f32 %v1235_v17  ;;  %v1239_v27 = vmul.f32 0.5, %v1232_v35  ;;  %v1244_v28 = vmul.f32 0.5, %v1234_v33 }
 0x130   :  { %v1188_v36 = vpop.f32.mrf.mxu0  ;;  %v1229_v13 = vpop.f32.mrf.mxu1 }
 0x131   :  { %2707 = vtanh.f32 %v1239_v27  ;;  %v2819_v36 = vmov 1966171168  }
 0x132   :  { %2709 = vtanh.f32 %v1233_v24  ;;  %v1256_v11 = vunpack.c.l.s4 %v2819_v36 }
 0x133   :  { %2711 = vtanh.f32 %v1244_v28 }
 0x134   :  { %v1257_v37 = vunpack.c.0.s8 %v1256_v11 }
 0x136   :  { %v3452_v22 = vsub.s32 %v1257_v37, %v3331_v12 }
 0x13c   :  { %v2706_v29 = vpop.eup %2705 }
 0x13d   :  { %v1237_v4 = vmul.f32 0.5, %v2706_v29 }
 0x13e   :  { %v2708_v26 = vpop.eup %2707 }
 0x13f   :  { %v1238_v14 = vadd.f32 0.5, %v1237_v4  ;;  %v1241_v34 = vmul.f32 0.5, %v2708_v26  ;;  %v2710_v40 = vpop.eup %2709 }
 0x140   :  { %v2712_v17 = vpop.eup %2711 }
 0x141   :  { %v1242_v6 = vadd.f32 0.5, %v1241_v34  ;;  %v1249_v2 = vmul.f32 %v2710_v40, %v1238_v14  ;;  %v1246_v16 = vmul.f32 0.5, %v2712_v17  ;;  %v4133_v34 = vmov 0  }
 0x143   :  { %v1248_v10 = vmul.f32 0.0, %v1242_v6  ;;  %v1247_v42 = vadd.f32 0.5, %v1246_v16 }
 0x145   :  { %v3448_v35 = vadd.f32 %v1249_v2, %v1248_v10 }
 0x147   :  { %2713 = vtanh.f32 %v3448_v35 }
 0x154   :  { %v2714_v23 = vpop.eup %2713 }
 0x155   :  { %v1252_v26 = vmul.f32 %v2714_v23, %v1247_v42 }
 0x157   :  { %v1254_v24 = vcombine.high %v1252_v26, %v1252_v26  ;;  %v1261_v27 = vrot.slane %v1252_v26, %v3452_v22  ;;  %v1323_v13 = vpack.c.bf16 %v1252_v26, %v1252_v26 }
 0x159   :  { %v1268_v15 = vrot.slane %v1254_v24, %v3452_v22  ;;  %v1269_v33 = vcombine.high %v1261_v27, %v1261_v27  ;;  %v1277_v28 = vrot.slane %v1261_v27, %v3452_v22  ;;  %2618 = vst.sshfl [vmem:[%s4109_s4] sm:$0x1 pattern:$0x73625140] %v1261_v27  ;;  %1357 = vmatmul.mubr.bf16.vlgmr.msra.gmra.mxu0 %v1323_v13 }
 0x15a   :  { %1398 = vmatmul.mubr.bf16.vlgmr.msra.gmra.mxu1 %v1323_v13  ;;  %1500 = vmatpush1.bf16.msra.mxu0 %v3114_v44 }
 0x15b   :  { %1541 = vmatpush1.bf16.msra.mxu1 %v3119_v18  ;;  %v1270_v12 = vcombine.high %v1268_v15, %v1268_v15  ;;  %v1284_v29 = vrot.slane %v1268_v15, %v3452_v22  ;;  %v1291_v4 = vrot.slane %v1269_v33, %v3452_v22  ;;  %v1299_v14 = vcombine.high %v1277_v28, %v1277_v28 }
 0x15c   :  { %2619 = vst.sshfl [vmem:[%s4109_s4 + $0x8] sm:$0x1 pattern:$0x73625140] %v1269_v33  ;;  %1501 = vmatprep.subr.bf16.mxu0 %v3124_v19  ;;  %1542 = vmatprep.subr.bf16.mxu1 %v3129_v32 }
 0x15d   :  { %2620 = vst.sshfl [vmem:[%s4109_s4 + $0x20] sm:$0x1 pattern:$0x73625140] %v1268_v15  ;;  %1531 = vmatprep.mubr.bf16.mxu0 %v4133_v34  ;;  %v1298_v40 = vrot.slane %v1270_v12, %v3452_v22  ;;  %v1300_v6 = vcombine.high %v1284_v29, %v1284_v29  ;;  %v1301_v2 = vcombine.high %v1291_v4, %v1291_v4  ;;  %1313 = vst [vmem:[%s4109_s4 + $0x10] sm:$0x1] %v1299_v14 }
 0x15e   :  { %2621 = vst.sshfl [vmem:[%s4109_s4 + $0x28] sm:$0x1 pattern:$0x73625140] %v1270_v12  ;;  %1572 = vmatprep.mubr.bf16.mxu1 %v4133_v34  ;;  %1502 = vmatpush1.bf16.msra.mxu0 %v3138_v45 }
 0x15f   :  { %1543 = vmatpush1.bf16.msra.mxu1 %v3143_v46  ;;  %v1302_v10 = vcombine.high %v1298_v40, %v1298_v40  ;;  %1314 = vst [vmem:[%s4109_s4 + $0x18] sm:$0x1] %v1301_v2  ;;  %1317 = vst [vmem:[%s4109_s4 + $0x30] sm:$0x1] %v1300_v6  ;;  %1503 = vmatprep.subr.bf16.mxu0 %v3150_v47 }
 0x160   :  { %1544 = vmatprep.subr.bf16.mxu1 %v3155_v48 }
 0x161   :  { %1318 = vst [vmem:[%s4109_s4 + $0x38] sm:$0x1] %v1302_v10 }
 0x162   :  { %1504 = vmatpush1.bf16.msra.mxu0 %v3164_v49 }
 0x163   :  { %1545 = vmatpush1.bf16.msra.mxu1 %v3169_v50  ;;  %1505 = vmatprep.subr.bf16.mxu0 %v3176_v51 }
 0x164   :  { %1546 = vmatprep.subr.bf16.mxu1 %v3181_v52 }
 0x166   :  { %1506 = vmatpush1.bf16.msra.mxu0 %v3188_v53 }
 0x167   :  { %1547 = vmatpush1.bf16.msra.mxu1 %v3193_v54  ;;  %1507 = vmatprep.subr.bf16.mxu0 %v3200_v55 }
 0x168   :  { %1548 = vmatprep.subr.bf16.mxu1 %v3205_v56 }
 0x16a   :  { %1508 = vmatpush1.bf16.msra.mxu0 %v3212_v57 }
 0x16b   :  { %1549 = vmatpush1.bf16.msra.mxu1 %v3217_v58  ;;  %1509 = vmatprep.subr.bf16.mxu0 %v3224_v59 }
 0x16c   :  { %1550 = vmatprep.subr.bf16.mxu1 %v3229_v60 }
 0x16e   :  { %1510 = vmatpush1.bf16.msra.mxu0 %v3236_v61 }
 0x16f   :  { %1551 = vmatpush1.bf16.msra.mxu1 %v3241_v62  ;;  %1511 = vmatprep.subr.bf16.mxu0 %v3248_v63 }
 0x170   :  { %1552 = vmatprep.subr.bf16.mxu1 %v3253_v0 }
 0x172   :  { %1512 = vmatpush1.bf16.msra.mxu0 %v3260_v1 }
 0x173   :  { %1553 = vmatpush1.bf16.msra.mxu1 %v3265_v3  ;;  %1513 = vmatprep.subr.bf16.mxu0 %v3272_v5 }
 0x174   :  { %1554 = vmatprep.subr.bf16.mxu1 %v3277_v7 }
 0x176   :  { %1514 = vmatpush1.bf16.msra.mxu0 %v3284_v8 }
 0x177   :  { %1555 = vmatpush1.bf16.msra.mxu1 %v3289_v9  ;;  %1674 = vmatprep.subr.bf16.mxu0 %v3094_v43 }
 0x178   :  { %1715 = vmatprep.subr.bf16.mxu1 %v3099_v31 }
 0x219   :  { %v1358_v36 = vpop.f32.mrf.mxu0 }
 0x21a   :  { %v1399_v11 = vpop.f32.mrf.mxu1  ;;  %v1406_v17 = vadd.f32 %v1358_v36, %v3357_v38 }
 0x21b   :  { %v1360_v16 = vpop.f32.mrf.mxu0  ;;  %v1408_v27 = vadd.f32 %v1399_v11, %v3360_v39 }
 0x21c   :  { %v1401_v37 = vpop.f32.mrf.mxu1  ;;  %v1410_v42 = vmul.f32 0.5, %v1406_v17  ;;  %v1407_v23 = vadd.f32 %v1360_v16, %v3363_v30 }
 0x21d   :  { %v1362_v26 = vpop.f32.mrf.mxu0  ;;  %v1409_v28 = vadd.f32 %v1401_v37, %v3366_v41 }
 0x21e   :  { %v1403_v24 = vpop.f32.mrf.mxu1  ;;  %2715 = vtanh.f32 %v1410_v42  ;;  %v1414_v13 = vmul.f32 0.5, %v1407_v23 }
 0x21f   :  { %v1363_v15 = vpop.f32.mrf.mxu0  ;;  %v1419_v12 = vmul.f32 0.5, %v1409_v28 }
 0x220   :  { %v1404_v33 = vpop.f32.mrf.mxu1  ;;  %2717 = vtanh.f32 %v1414_v13 }
 0x221   :  { %2719 = vtanh.f32 %v1408_v27 }
 0x222   :  { %2721 = vtanh.f32 %v1419_v12 }
 0x22b   :  { %v2716_v29 = vpop.eup %2715 }
 0x22c   :  { %v1412_v38 = vmul.f32 0.5, %v2716_v29 }
 0x22d   :  { %v2718_v4 = vpop.eup %2717 }
 0x22e   :  { %v1413_v14 = vadd.f32 0.5, %v1412_v38  ;;  %v1416_v40 = vmul.f32 0.5, %v2718_v4  ;;  %v2720_v30 = vpop.eup %2719 }
 0x22f   :  { %v2722_v36 = vpop.eup %2721 }
 0x230   :  { %v1417_v6 = vadd.f32 0.5, %v1416_v40  ;;  %v1424_v2 = vmul.f32 %v2720_v30, %v1413_v14  ;;  %v1421_v11 = vmul.f32 0.5, %v2722_v36 }
 0x232   :  { %v1423_v10 = vmul.f32 %v1417_v6, %v3448_v35  ;;  %v1422_v17 = vadd.f32 0.5, %v1421_v11 }
 0x234   :  { %v3523_v39 = vadd.f32 %v1424_v2, %v1423_v10 }
 0x236   :  { %2723 = vtanh.f32 %v3523_v39 }
 0x243   :  { %v2724_v41 = vpop.eup %2723 }
 0x244   :  { %v1427_v16 = vmul.f32 %v2724_v41, %v1422_v17 }
 0x246   :  { %v1429_v37 = vcombine.high %v1427_v16, %v1427_v16  ;;  %v1436_v42 = vrot.slane %v1427_v16, %v3452_v22  ;;  %v1498_v23 = vpack.c.bf16 %v1427_v16, %v1427_v16 }
 0x248   :  { %v1443_v26 = vrot.slane %v1429_v37, %v3452_v22  ;;  %v1444_v24 = vcombine.high %v1436_v42, %v1436_v42  ;;  %v1452_v27 = vrot.slane %v1436_v42, %v3452_v22  ;;  %2622 = vst.sshfl [vmem:[%s4109_s4 + $0x1] sm:$0x1 pattern:$0x73625140] %v1436_v42  ;;  %1532 = vmatmul.mubr.bf16.vlgmr.msra.gmra.mxu0 %v1498_v23  ;;  %v4134_v42 = vld [vmem:[#allocation5_spill] sm:$0xff] }
 0x249   :  { %1573 = vmatmul.mubr.bf16.vlgmr.msra.gmra.mxu1 %v1498_v23  ;;  %1675 = vmatpush1.bf16.msra.mxu0 %v3114_v44 }
 0x24a   :  { %1716 = vmatpush1.bf16.msra.mxu1 %v3119_v18  ;;  %v1445_v35 = vcombine.high %v1443_v26, %v1443_v26  ;;  %v1459_v13 = vrot.slane %v1443_v26, %v3452_v22  ;;  %v1466_v15 = vrot.slane %v1444_v24, %v3452_v22  ;;  %v1474_v33 = vcombine.high %v1452_v27, %v1452_v27 }
 0x24b   :  { %2623 = vst.sshfl [vmem:[%s4109_s4 + $0x9] sm:$0x1 pattern:$0x73625140] %v1444_v24  ;;  %1676 = vmatprep.subr.bf16.mxu0 %v3124_v19  ;;  %1717 = vmatprep.subr.bf16.mxu1 %v3129_v32 }
 0x24c   :  { %2624 = vst.sshfl [vmem:[%s4109_s4 + $0x21] sm:$0x1 pattern:$0x73625140] %v1443_v26  ;;  %1706 = vmatprep.mubr.bf16.mxu0 %v4133_v34  ;;  %v1473_v28 = vrot.slane %v1445_v35, %v3452_v22  ;;  %v1475_v12 = vcombine.high %v1459_v13, %v1459_v13  ;;  %v1476_v29 = vcombine.high %v1466_v15, %v1466_v15  ;;  %1488 = vst [vmem:[%s4109_s4 + $0x11] sm:$0x1] %v1474_v33 }
 0x24d   :  { %2625 = vst.sshfl [vmem:[%s4109_s4 + $0x29] sm:$0x1 pattern:$0x73625140] %v1445_v35  ;;  %1747 = vmatprep.mubr.bf16.mxu1 %v4133_v34  ;;  %1677 = vmatpush1.bf16.msra.mxu0 %v3138_v45 }
 0x24e   :  { %1718 = vmatpush1.bf16.msra.mxu1 %v3143_v46  ;;  %v1477_v38 = vcombine.high %v1473_v28, %v1473_v28  ;;  %1489 = vst [vmem:[%s4109_s4 + $0x19] sm:$0x1] %v1476_v29  ;;  %1492 = vst [vmem:[%s4109_s4 + $0x31] sm:$0x1] %v1475_v12  ;;  %1678 = vmatprep.subr.bf16.mxu0 %v3150_v47 }
 0x24f   :  { %1719 = vmatprep.subr.bf16.mxu1 %v3155_v48 }
 0x250   :  { %1493 = vst [vmem:[%s4109_s4 + $0x39] sm:$0x1] %v1477_v38 }
 0x251   :  { %1679 = vmatpush1.bf16.msra.mxu0 %v3164_v49 }
 0x252   :  { %1720 = vmatpush1.bf16.msra.mxu1 %v3169_v50  ;;  %1680 = vmatprep.subr.bf16.mxu0 %v3176_v51 }
 0x253   :  { %1721 = vmatprep.subr.bf16.mxu1 %v3181_v52 }
 0x255   :  { %1681 = vmatpush1.bf16.msra.mxu0 %v3188_v53 }
 0x256   :  { %1722 = vmatpush1.bf16.msra.mxu1 %v3193_v54  ;;  %1682 = vmatprep.subr.bf16.mxu0 %v3200_v55 }
 0x257   :  { %1723 = vmatprep.subr.bf16.mxu1 %v3205_v56 }
 0x259   :  { %1683 = vmatpush1.bf16.msra.mxu0 %v3212_v57 }
 0x25a   :  { %1724 = vmatpush1.bf16.msra.mxu1 %v3217_v58  ;;  %1684 = vmatprep.subr.bf16.mxu0 %v3224_v59 }
 0x25b   :  { %1725 = vmatprep.subr.bf16.mxu1 %v3229_v60 }
 0x25d   :  { %1685 = vmatpush1.bf16.msra.mxu0 %v3236_v61 }
 0x25e   :  { %1726 = vmatpush1.bf16.msra.mxu1 %v3241_v62  ;;  %1686 = vmatprep.subr.bf16.mxu0 %v3248_v63 }
 0x25f   :  { %1727 = vmatprep.subr.bf16.mxu1 %v3253_v0 }
 0x261   :  { %1687 = vmatpush1.bf16.msra.mxu0 %v3260_v1 }
 0x262   :  { %1728 = vmatpush1.bf16.msra.mxu1 %v3265_v3  ;;  %1688 = vmatprep.subr.bf16.mxu0 %v3272_v5 }
 0x263   :  { %1729 = vmatprep.subr.bf16.mxu1 %v3277_v7 }
 0x265   :  { %1689 = vmatpush1.bf16.msra.mxu0 %v3284_v8 }
 0x266   :  { %1730 = vmatpush1.bf16.msra.mxu1 %v3289_v9  ;;  %1849 = vmatprep.subr.bf16.mxu0 %v3094_v43 }
 0x267   :  { %1890 = vmatprep.subr.bf16.mxu1 %v3099_v31 }
 0x308   :  { %v1533_v4 = vpop.f32.mrf.mxu0 }
 0x309   :  { %v1574_v14 = vpop.f32.mrf.mxu1  ;;  %v1581_v40 = vadd.f32 %v1533_v4, %v3369_v20 }
 0x30a   :  { %v1535_v30 = vpop.f32.mrf.mxu0  ;;  %v1583_v17 = vadd.f32 %v1574_v14, %v3372_v21 }
 0x30b   :  { %v1576_v6 = vpop.f32.mrf.mxu1  ;;  %v1585_v2 = vmul.f32 0.5, %v1581_v40  ;;  %v1582_v10 = vadd.f32 %v1535_v30, %v3375_v25 }
 0x30c   :  { %v1537_v36 = vpop.f32.mrf.mxu0  ;;  %v1584_v23 = vadd.f32 %v1576_v6, %v4134_v42 }
 0x30d   :  { %v1578_v11 = vpop.f32.mrf.mxu1  ;;  %2725 = vtanh.f32 %v1585_v2  ;;  %v1589_v41 = vmul.f32 0.5, %v1582_v10 }
 0x30e   :  { %v1538_v16 = vpop.f32.mrf.mxu0  ;;  %v1594_v26 = vmul.f32 0.5, %v1584_v23 }
 0x30f   :  { %v1579_v37 = vpop.f32.mrf.mxu1  ;;  %2727 = vtanh.f32 %v1589_v41 }
 0x310   :  { %2729 = vtanh.f32 %v1583_v17 }
 0x311   :  { %2731 = vtanh.f32 %v1594_v26 }
 0x31a   :  { %v2726_v24 = vpop.eup %2725 }
 0x31b   :  { %v1587_v20 = vmul.f32 0.5, %v2726_v24 }
 0x31c   :  { %v2728_v27 = vpop.eup %2727 }
 0x31d   :  { %v1588_v35 = vadd.f32 0.5, %v1587_v20  ;;  %v1591_v13 = vmul.f32 0.5, %v2728_v27  ;;  %v2730_v25 = vpop.eup %2729 }
 0x31e   :  { %v2732_v12 = vpop.eup %2731 }
 0x31f   :  { %v1592_v15 = vadd.f32 0.5, %v1591_v13  ;;  %v1599_v33 = vmul.f32 %v2730_v25, %v1588_v35  ;;  %v1596_v29 = vmul.f32 0.5, %v2732_v12 }
 0x321   :  { %v1598_v28 = vmul.f32 %v1592_v15, %v3523_v39  ;;  %v1597_v38 = vadd.f32 0.5, %v1596_v29 }
 0x323   :  { %v3595_v21 = vadd.f32 %v1599_v33, %v1598_v28  ;;  %v3679_v33 = vld [vmem:[%s4107_s2 + $0xe0] ss:$16 sps:$4 sm:$0xff]   ;;  %v3685_v28 = vld [vmem:[%s4107_s2 + $0xe8] ss:$16 sps:$4 sm:$0xff]  }
 0x325   :  { %2733 = vtanh.f32 %v3595_v21 }
 0x332   :  { %v2734_v4 = vpop.eup %2733 }
 0x333   :  { %v1602_v14 = vmul.f32 %v2734_v4, %v1597_v38  ;;  %v3699_v4 = vld [vmem:[%s4107_s2 + $0xc4] ss:$16 sps:$4 sm:$0xff]  }
 0x335   :  { %v1604_v40 = vcombine.high %v1602_v14, %v1602_v14  ;;  %v1611_v30 = vrot.slane %v1602_v14, %v3452_v22  ;;  %v1673_v6 = vpack.c.bf16 %v1602_v14, %v1602_v14  ;;  %v3705_v14 = vld [vmem:[%s4107_s2 + $0xcc] ss:$16 sps:$4 sm:$0xff]  }
 0x337   :  { %v1618_v2 = vrot.slane %v1604_v40, %v3452_v22  ;;  %v1619_v10 = vcombine.high %v1611_v30, %v1611_v30  ;;  %v1627_v36 = vrot.slane %v1611_v30, %v3452_v22  ;;  %2626 = vst.sshfl [vmem:[%s4109_s4 + $0x2] sm:$0x1 pattern:$0x73625140] %v1611_v30  ;;  %1707 = vmatmul.mubr.bf16.vlgmr.msra.gmra.mxu0 %v1673_v6 }
 0x338   :  { %1748 = vmatmul.mubr.bf16.vlgmr.msra.gmra.mxu1 %v1673_v6  ;;  %1850 = vmatpush1.bf16.msra.mxu0 %v3114_v44 }
 0x339   :  { %1891 = vmatpush1.bf16.msra.mxu1 %v3119_v18  ;;  %v1620_v39 = vcombine.high %v1618_v2, %v1618_v2  ;;  %v1634_v11 = vrot.slane %v1618_v2, %v3452_v22  ;;  %v1641_v17 = vrot.slane %v1619_v10, %v3452_v22  ;;  %v1649_v41 = vcombine.high %v1627_v36, %v1627_v36 }
 0x33a   :  { %2627 = vst.sshfl [vmem:[%s4109_s4 + $0xa] sm:$0x1 pattern:$0x73625140] %v1619_v10  ;;  %1851 = vmatprep.subr.bf16.mxu0 %v3124_v19  ;;  %1892 = vmatprep.subr.bf16.mxu1 %v3129_v32  ;;  %v3726_v10 = vld [vmem:[%s4107_s2 + $0xc8] ss:$16 sps:$4 sm:$0xff]  }
 0x33b   :  { %2628 = vst.sshfl [vmem:[%s4109_s4 + $0x22] sm:$0x1 pattern:$0x73625140] %v1618_v2  ;;  %1881 = vmatprep.mubr.bf16.mxu0 %v4133_v34  ;;  %v1648_v44 = vrot.slane %v1620_v39, %v3452_v22  ;;  %v1650_v18 = vcombine.high %v1634_v11, %v1634_v11  ;;  %v1651_v16 = vcombine.high %v1641_v17, %v1641_v17  ;;  %1663 = vst [vmem:[%s4109_s4 + $0x12] sm:$0x1] %v1649_v41 }
 0x33c   :  { %2629 = vst.sshfl [vmem:[%s4109_s4 + $0x2a] sm:$0x1 pattern:$0x73625140] %v1620_v39  ;;  %1922 = vmatprep.mubr.bf16.mxu1 %v4133_v34  ;;  %1852 = vmatpush1.bf16.msra.mxu0 %v3138_v45  ;;  %v3720_v2 = vld [vmem:[%s4107_s2 + $0xc0] ss:$16 sps:$4 sm:$0xff]  }
 0x33d   :  { %1893 = vmatpush1.bf16.msra.mxu1 %v3143_v46  ;;  %v1652_v19 = vcombine.high %v1648_v44, %v1648_v44  ;;  %1664 = vst [vmem:[%s4109_s4 + $0x1a] sm:$0x1] %v1651_v16  ;;  %1667 = vst [vmem:[%s4109_s4 + $0x32] sm:$0x1] %v1650_v18  ;;  %1853 = vmatprep.subr.bf16.mxu0 %v3150_v47  ;;  %v4135_v46 = vld [vmem:[#allocation6_spill] sm:$0xff] }
 0x33e   :  { %1894 = vmatprep.subr.bf16.mxu1 %v3155_v48  ;;  %v3738_v39 = vld [vmem:[%s4107_s2 + $0xa4] ss:$16 sps:$4 sm:$0xff]   ;;  %v3744_v11 = vld [vmem:[%s4107_s2 + $0xac] ss:$16 sps:$4 sm:$0xff]   ;;  %v3753_v17 = vld [vmem:[%s4107_s2 + $0xa0] ss:$16 sps:$4 sm:$0xff]  }
 0x33f   :  { %1668 = vst [vmem:[%s4109_s4 + $0x3a] sm:$0x1] %v1652_v19  ;;  %v3759_v41 = vld [vmem:[%s4107_s2 + $0xa8] ss:$16 sps:$4 sm:$0xff]   ;;  %v3765_v44 = vld [vmem:[%s4107_s2 + $0x84] ss:$16 sps:$4 sm:$0xff]  }
 0x340   :  { %1854 = vmatpush1.bf16.msra.mxu0 %v3164_v49  ;;  %v3771_v18 = vld [vmem:[%s4107_s2 + $0x8c] ss:$16 sps:$4 sm:$0xff]   ;;  %v3777_v16 = vld [vmem:[%s4107_s2 + $0x80] ss:$16 sps:$4 sm:$0xff]   ;;  %v3783_v19 = vld [vmem:[%s4107_s2 + $0x88] ss:$16 sps:$4 sm:$0xff]  }
 0x341   :  { %1895 = vmatpush1.bf16.msra.mxu1 %v3169_v50  ;;  %1855 = vmatprep.subr.bf16.mxu0 %v3176_v51  ;;  %v4136_v51 = vld [vmem:[#allocation8_spill] sm:$0xff] }
 0x342   :  { %1896 = vmatprep.subr.bf16.mxu1 %v3181_v52 }
 0x344   :  { %1856 = vmatpush1.bf16.msra.mxu0 %v3188_v53 }
 0x345   :  { %1897 = vmatpush1.bf16.msra.mxu1 %v3193_v54  ;;  %1857 = vmatprep.subr.bf16.mxu0 %v3200_v55  ;;  %v4137_v55 = vld [vmem:[#allocation7_spill] sm:$0xff] }
 0x346   :  { %1898 = vmatprep.subr.bf16.mxu1 %v3205_v56 }
 0x348   :  { %1858 = vmatpush1.bf16.msra.mxu0 %v3212_v57 }
 0x349   :  { %1899 = vmatpush1.bf16.msra.mxu1 %v3217_v58  ;;  %1859 = vmatprep.subr.bf16.mxu0 %v3224_v59 }
 0x34a   :  { %1900 = vmatprep.subr.bf16.mxu1 %v3229_v60 }
 0x34c   :  { %1860 = vmatpush1.bf16.msra.mxu0 %v3236_v61 }
 0x34d   :  { %1901 = vmatpush1.bf16.msra.mxu1 %v3241_v62  ;;  %1861 = vmatprep.subr.bf16.mxu0 %v3248_v63 }
 0x34e   :  { %1902 = vmatprep.subr.bf16.mxu1 %v3253_v0 }
 0x350   :  { %1862 = vmatpush1.bf16.msra.mxu0 %v3260_v1 }
 0x351   :  { %1903 = vmatpush1.bf16.msra.mxu1 %v3265_v3  ;;  %1863 = vmatprep.subr.bf16.mxu0 %v3272_v5 }
 0x352   :  { %1904 = vmatprep.subr.bf16.mxu1 %v3277_v7 }
 0x354   :  { %1864 = vmatpush1.bf16.msra.mxu0 %v3284_v8 }
 0x355   :  { %1905 = vmatpush1.bf16.msra.mxu1 %v3289_v9  ;;  %2024 = vmatprep.subr.bf16.mxu0 %v3094_v43  ;;  %v4138_v43 = vld [vmem:[#allocation9_spill] sm:$0xff] }
 0x356   :  { %2065 = vmatprep.subr.bf16.mxu1 %v3099_v31 }
 0x3f7   :  { %v1708_v32 = vpop.f32.mrf.mxu0 }
 0x3f8   :  { %v1749_v45 = vpop.f32.mrf.mxu1  ;;  %v1756_v47 = vadd.f32 %v1708_v32, %v4135_v46  ;;  %v3789_v32 = vld [vmem:[%s4107_s2 + $0x64] ss:$16 sps:$4 sm:$0xff]   ;;  %v3801_v46 = vld [vmem:[%s4107_s2 + $0x60] ss:$16 sps:$4 sm:$0xff]  }
 0x3f9   :  { %v1710_v48 = vpop.f32.mrf.mxu0  ;;  %v1758_v56 = vadd.f32 %v1749_v45, %v4137_v55  ;;  %v3795_v45 = vld [vmem:[%s4107_s2 + $0x6c] ss:$16 sps:$4 sm:$0xff]   ;;  %v3855_v55 = vld [vmem:[%s4107_s2 + $0x28] ss:$16 sps:$4 sm:$0xff]  }
 0x3fa   :  { %v1751_v49 = vpop.f32.mrf.mxu1  ;;  %v1760_v50 = vmul.f32 0.5, %v1756_v47  ;;  %v1757_v52 = vadd.f32 %v1710_v48, %v4136_v51  ;;  %v3807_v47 = vld [vmem:[%s4107_s2 + $0x68] ss:$16 sps:$4 sm:$0xff]   ;;  %v3813_v48 = vld [vmem:[%s4107_s2 + $0x44] ss:$16 sps:$4 sm:$0xff]  }
 0x3fb   :  { %v1712_v53 = vpop.f32.mrf.mxu0  ;;  %v1759_v31 = vadd.f32 %v1751_v49, %v4138_v43  ;;  %v3819_v49 = vld [vmem:[%s4107_s2 + $0x4c] ss:$16 sps:$4 sm:$0xff]   ;;  %v3831_v51 = vld [vmem:[%s4107_s2 + $0x48] ss:$16 sps:$4 sm:$0xff]   ;;  %v3885_v43 = vld [vmem:[%s4107_s2 + $0xe4] ss:$16 sps:$4 sm:$0xff]  }
 0x3fc   :  { %v1753_v54 = vpop.f32.mrf.mxu1  ;;  %2735 = vtanh.f32 %v1760_v50  ;;  %v1764_v57 = vmul.f32 0.5, %v1757_v52  ;;  %v3825_v50 = vld [vmem:[%s4107_s2 + $0x40] ss:$16 sps:$4 sm:$0xff]   ;;  %v3837_v52 = vld [vmem:[%s4107_s2 + $0x24] ss:$16 sps:$4 sm:$0xff]  }
 0x3fd   :  { %v1713_v58 = vpop.f32.mrf.mxu0  ;;  %v1769_v60 = vmul.f32 0.5, %v1759_v31  ;;  %v3843_v53 = vld [vmem:[%s4107_s2 + $0x2c] ss:$16 sps:$4 sm:$0xff]   ;;  %v3849_v54 = vld [vmem:[%s4107_s2 + $0x20] ss:$16 sps:$4 sm:$0xff]  }
 0x3fe   :  { %v1754_v59 = vpop.f32.mrf.mxu1  ;;  %2737 = vtanh.f32 %v1764_v57  ;;  %v3867_v57 = vld [vmem:[%s4107_s2 + $0xc] ss:$16 sps:$4 sm:$0xff]   ;;  %v3873_v58 = vld [vmem:[%s4107_s2] ss:$16 sps:$4 sm:$0xff]  }
 0x3ff   :  { %2739 = vtanh.f32 %v1758_v56  ;;  %v3861_v56 = vld [vmem:[%s4107_s2 + $0x4] ss:$16 sps:$4 sm:$0xff]   ;;  %v3879_v59 = vld [vmem:[%s4107_s2 + $0x8] ss:$16 sps:$4 sm:$0xff]   ;;  %v3891_v31 = vld [vmem:[%s4107_s2 + $0xec] ss:$16 sps:$4 sm:$0xff]  }
 0x400   :  { %2741 = vtanh.f32 %v1769_v60 }
 0x409   :  { %v2736_v61 = vpop.eup %2735 }
 0x40a   :  { %v1762_v62 = vmul.f32 0.5, %v2736_v61 }
 0x40b   :  { %v2738_v63 = vpop.eup %2737 }
 0x40c   :  { %v1763_v0 = vadd.f32 0.5, %v1762_v62  ;;  %v1766_v1 = vmul.f32 0.5, %v2738_v63  ;;  %v2740_v3 = vpop.eup %2739  ;;  %v4139_v62 = vld [vmem:[#allocation10_spill] sm:$0xff] }
 0x40d   :  { %v2742_v37 = vpop.eup %2741 }
 0x40e   :  { %v1767_v5 = vadd.f32 0.5, %v1766_v1  ;;  %v1774_v7 = vmul.f32 %v2740_v3, %v1763_v0  ;;  %v1771_v42 = vmul.f32 0.5, %v2742_v37 }
 0x410   :  { %v1773_v8 = vmul.f32 %v1767_v5, %v3595_v21  ;;  %v1772_v23 = vadd.f32 0.5, %v1771_v42  ;;  %v4140_v5 = vld [vmem:[#allocation12_spill] sm:$0xff]  ;;  %v4141_v42 = vld [vmem:[#allocation11_spill] sm:$0xff] }
 0x412   :  { %v3667_v9 = vadd.f32 %v1774_v7, %v1773_v8 }
 0x414   :  { %2743 = vtanh.f32 %v3667_v9 }
 0x421   :  { %v2744_v26 = vpop.eup %2743 }
 0x422   :  { %v1777_v24 = vmul.f32 %v2744_v26, %v1772_v23 }
 0x424   :  { %v1779_v20 = vcombine.high %v1777_v24, %v1777_v24  ;;  %v1786_v27 = vrot.slane %v1777_v24, %v3452_v22  ;;  %v1848_v35 = vpack.c.bf16 %v1777_v24, %v1777_v24 }
 0x426   :  { %v1793_v13 = vrot.slane %v1779_v20, %v3452_v22  ;;  %v1794_v25 = vcombine.high %v1786_v27, %v1786_v27  ;;  %v1802_v15 = vrot.slane %v1786_v27, %v3452_v22  ;;  %2630 = vst.sshfl [vmem:[%s4109_s4 + $0x3] sm:$0x1 pattern:$0x73625140] %v1786_v27  ;;  %1882 = vmatmul.mubr.bf16.vlgmr.msra.gmra.mxu0 %v1848_v35  ;;  %v4142_v27 = vld [vmem:[#allocation13_spill] sm:$0xff] }
 0x427   :  { %1923 = vmatmul.mubr.bf16.vlgmr.msra.gmra.mxu1 %v1848_v35  ;;  %2025 = vmatpush1.bf16.msra.mxu0 %v3679_v33 }
 0x428   :  { %2066 = vmatpush1.bf16.msra.mxu1 %v3685_v28  ;;  %v1795_v21 = vcombine.high %v1793_v13, %v1793_v13  ;;  %v1809_v12 = vrot.slane %v1793_v13, %v3452_v22  ;;  %v1816_v29 = vrot.slane %v1794_v25, %v3452_v22  ;;  %v1824_v38 = vcombine.high %v1802_v15, %v1802_v15 }
 0x429   :  { %2631 = vst.sshfl [vmem:[%s4109_s4 + $0xb] sm:$0x1 pattern:$0x73625140] %v1794_v25  ;;  %2026 = vmatprep.subr.bf16.mxu0 %v3699_v4  ;;  %2067 = vmatprep.subr.bf16.mxu1 %v3705_v14 }
 0x42a   :  { %2632 = vst.sshfl [vmem:[%s4109_s4 + $0x23] sm:$0x1 pattern:$0x73625140] %v1793_v13  ;;  %2056 = vmatprep.mubr.bf16.mxu0 %v4133_v34  ;;  %v1823_v40 = vrot.slane %v1795_v21, %v3452_v22  ;;  %v1825_v30 = vcombine.high %v1809_v12, %v1809_v12  ;;  %v1826_v6 = vcombine.high %v1816_v29, %v1816_v29  ;;  %1838 = vst [vmem:[%s4109_s4 + $0x13] sm:$0x1] %v1824_v38 }
 0x42b   :  { %2633 = vst.sshfl [vmem:[%s4109_s4 + $0x2b] sm:$0x1 pattern:$0x73625140] %v1795_v21  ;;  %2097 = vmatprep.mubr.bf16.mxu1 %v4133_v34  ;;  %2027 = vmatpush1.bf16.msra.mxu0 %v3720_v2 }
 0x42c   :  { %2068 = vmatpush1.bf16.msra.mxu1 %v3726_v10  ;;  %v1827_v36 = vcombine.high %v1823_v40, %v1823_v40  ;;  %1839 = vst [vmem:[%s4109_s4 + $0x1b] sm:$0x1] %v1826_v6  ;;  %1842 = vst [vmem:[%s4109_s4 + $0x33] sm:$0x1] %v1825_v30  ;;  %2028 = vmatprep.subr.bf16.mxu0 %v3738_v39 }
 0x42d   :  { %2069 = vmatprep.subr.bf16.mxu1 %v3744_v11 }
 0x42e   :  { %1843 = vst [vmem:[%s4109_s4 + $0x3b] sm:$0x1] %v1827_v36 }
 0x42f   :  { %2029 = vmatpush1.bf16.msra.mxu0 %v3753_v17 }
 0x430   :  { %2070 = vmatpush1.bf16.msra.mxu1 %v3759_v41  ;;  %2030 = vmatprep.subr.bf16.mxu0 %v3765_v44 }
 0x431   :  { %2071 = vmatprep.subr.bf16.mxu1 %v3771_v18 }
 0x433   :  { %2031 = vmatpush1.bf16.msra.mxu0 %v3777_v16 }
 0x434   :  { %2072 = vmatpush1.bf16.msra.mxu1 %v3783_v19  ;;  %2032 = vmatprep.subr.bf16.mxu0 %v3789_v32 }
 0x435   :  { %2073 = vmatprep.subr.bf16.mxu1 %v3795_v45 }
 0x437   :  { %2033 = vmatpush1.bf16.msra.mxu0 %v3801_v46 }
 0x438   :  { %2074 = vmatpush1.bf16.msra.mxu1 %v3807_v47  ;;  %2034 = vmatprep.subr.bf16.mxu0 %v3813_v48 }
 0x439   :  { %2075 = vmatprep.subr.bf16.mxu1 %v3819_v49 }
 0x43b   :  { %2035 = vmatpush1.bf16.msra.mxu0 %v3825_v50 }
 0x43c   :  { %2076 = vmatpush1.bf16.msra.mxu1 %v3831_v51  ;;  %2036 = vmatprep.subr.bf16.mxu0 %v3837_v52 }
 0x43d   :  { %2077 = vmatprep.subr.bf16.mxu1 %v3843_v53 }
 0x43f   :  { %2037 = vmatpush1.bf16.msra.mxu0 %v3849_v54 }
 0x440   :  { %2078 = vmatpush1.bf16.msra.mxu1 %v3855_v55  ;;  %2038 = vmatprep.subr.bf16.mxu0 %v3861_v56 }
 0x441   :  { %2079 = vmatprep.subr.bf16.mxu1 %v3867_v57 }
 0x443   :  { %2039 = vmatpush1.bf16.msra.mxu0 %v3873_v58 }
 0x444   :  { %2080 = vmatpush1.bf16.msra.mxu1 %v3879_v59  ;;  %2199 = vmatprep.subr.bf16.mxu0 %v3885_v43 }
 0x445   :  { %2240 = vmatprep.subr.bf16.mxu1 %v3891_v31 }
 0x4e6   :  { %v1883_v60 = vpop.f32.mrf.mxu0 }
 0x4e7   :  { %v1924_v61 = vpop.f32.mrf.mxu1  ;;  %v1931_v63 = vadd.f32 %v1883_v60, %v4139_v62 }
 0x4e8   :  { %v1885_v0 = vpop.f32.mrf.mxu0  ;;  %v1933_v23 = vadd.f32 %v1924_v61, %v4141_v42 }
 0x4e9   :  { %v1926_v1 = vpop.f32.mrf.mxu1  ;;  %v1935_v3 = vmul.f32 0.5, %v1931_v63  ;;  %v1932_v7 = vadd.f32 %v1885_v0, %v4140_v5 }
 0x4ea   :  { %v1887_v8 = vpop.f32.mrf.mxu0  ;;  %v1934_v35 = vadd.f32 %v1926_v1, %v4142_v27 }
 0x4eb   :  { %v1928_v37 = vpop.f32.mrf.mxu1  ;;  %2745 = vtanh.f32 %v1935_v3  ;;  %v1939_v26 = vmul.f32 0.5, %v1932_v7 }
 0x4ec   :  { %v1888_v24 = vpop.f32.mrf.mxu0  ;;  %v1944_v13 = vmul.f32 0.5, %v1934_v35 }
 0x4ed   :  { %v1929_v20 = vpop.f32.mrf.mxu1  ;;  %2747 = vtanh.f32 %v1939_v26 }
 0x4ee   :  { %2749 = vtanh.f32 %v1933_v23 }
 0x4ef   :  { %2751 = vtanh.f32 %v1944_v13 }
 0x4f8   :  { %v2746_v25 = vpop.eup %2745 }
 0x4f9   :  { %v1937_v15 = vmul.f32 0.5, %v2746_v25 }
 0x4fa   :  { %v2748_v21 = vpop.eup %2747 }
 0x4fb   :  { %v1938_v12 = vadd.f32 0.5, %v1937_v15  ;;  %v1941_v29 = vmul.f32 0.5, %v2748_v21  ;;  %v2750_v38 = vpop.eup %2749  ;;  %v4143_v15 = vld [vmem:[#allocation14_spill] sm:$0xff] }
 0x4fc   :  { %v2752_v60 = vpop.eup %2751 }
 0x4fd   :  { %v1942_v40 = vadd.f32 0.5, %v1941_v29  ;;  %v1949_v30 = vmul.f32 %v2750_v38, %v1938_v12  ;;  %v1946_v61 = vmul.f32 0.5, %v2752_v60 }
 0x4ff   :  { %v1948_v6 = vmul.f32 %v1942_v40, %v3667_v9  ;;  %v1947_v62 = vadd.f32 0.5, %v1946_v61  ;;  %v4144_v40 = vld [vmem:[#allocation16_spill] sm:$0xff]  ;;  %v4145_v61 = vld [vmem:[#allocation15_spill] sm:$0xff] }
 0x501   :  { %v3899_v36 = vadd.f32 %v1949_v30, %v1948_v6 }
 0x503   :  { %2753 = vtanh.f32 %v3899_v36 }
 0x510   :  { %v2754_v63 = vpop.eup %2753 }
 0x511   :  { %v1952_v0 = vmul.f32 %v2754_v63, %v1947_v62 }
 0x513   :  { %v1954_v1 = vcombine.high %v1952_v0, %v1952_v0  ;;  %v1961_v3 = vrot.slane %v1952_v0, %v3452_v22  ;;  %v2023_v5 = vpack.c.bf16 %v1952_v0, %v1952_v0 }
 0x515   :  { %v1968_v7 = vrot.slane %v1954_v1, %v3452_v22  ;;  %v1969_v8 = vcombine.high %v1961_v3, %v1961_v3  ;;  %v1977_v37 = vrot.slane %v1961_v3, %v3452_v22  ;;  %2634 = vst.sshfl [vmem:[%s4109_s4 + $0x4] sm:$0x1 pattern:$0x73625140] %v1961_v3  ;;  %2057 = vmatmul.mubr.bf16.vlgmr.msra.gmra.mxu0 %v2023_v5 }
 0x516   :  { %2098 = vmatmul.mubr.bf16.vlgmr.msra.gmra.mxu1 %v2023_v5  ;;  %2200 = vmatpush1.bf16.msra.mxu0 %v3679_v33 }
 0x517   :  { %2241 = vmatpush1.bf16.msra.mxu1 %v3685_v28  ;;  %v1970_v9 = vcombine.high %v1968_v7, %v1968_v7  ;;  %v1984_v42 = vrot.slane %v1968_v7, %v3452_v22  ;;  %v1991_v23 = vrot.slane %v1969_v8, %v3452_v22  ;;  %v1999_v26 = vcombine.high %v1977_v37, %v1977_v37 }
 0x518   :  { %2635 = vst.sshfl [vmem:[%s4109_s4 + $0xc] sm:$0x1 pattern:$0x73625140] %v1969_v8  ;;  %2201 = vmatprep.subr.bf16.mxu0 %v3699_v4  ;;  %2242 = vmatprep.subr.bf16.mxu1 %v3705_v14 }
 0x519   :  { %2636 = vst.sshfl [vmem:[%s4109_s4 + $0x24] sm:$0x1 pattern:$0x73625140] %v1968_v7  ;;  %2231 = vmatprep.mubr.bf16.mxu0 %v4133_v34  ;;  %v1998_v24 = vrot.slane %v1970_v9, %v3452_v22  ;;  %v2000_v20 = vcombine.high %v1984_v42, %v1984_v42  ;;  %v2001_v27 = vcombine.high %v1991_v23, %v1991_v23  ;;  %2013 = vst [vmem:[%s4109_s4 + $0x14] sm:$0x1] %v1999_v26 }
 0x51a   :  { %2637 = vst.sshfl [vmem:[%s4109_s4 + $0x2c] sm:$0x1 pattern:$0x73625140] %v1970_v9  ;;  %2272 = vmatprep.mubr.bf16.mxu1 %v4133_v34  ;;  %2202 = vmatpush1.bf16.msra.mxu0 %v3720_v2 }
 0x51b   :  { %2243 = vmatpush1.bf16.msra.mxu1 %v3726_v10  ;;  %v2002_v35 = vcombine.high %v1998_v24, %v1998_v24  ;;  %2014 = vst [vmem:[%s4109_s4 + $0x1c] sm:$0x1] %v2001_v27  ;;  %2017 = vst [vmem:[%s4109_s4 + $0x34] sm:$0x1] %v2000_v20  ;;  %2203 = vmatprep.subr.bf16.mxu0 %v3738_v39 }
 0x51c   :  { %2244 = vmatprep.subr.bf16.mxu1 %v3744_v11 }
 0x51d   :  { %2018 = vst [vmem:[%s4109_s4 + $0x3c] sm:$0x1] %v2002_v35 }
 0x51e   :  { %2204 = vmatpush1.bf16.msra.mxu0 %v3753_v17 }
 0x51f   :  { %2245 = vmatpush1.bf16.msra.mxu1 %v3759_v41  ;;  %2205 = vmatprep.subr.bf16.mxu0 %v3765_v44 }
 0x520   :  { %2246 = vmatprep.subr.bf16.mxu1 %v3771_v18 }
 0x522   :  { %2206 = vmatpush1.bf16.msra.mxu0 %v3777_v16 }
 0x523   :  { %2247 = vmatpush1.bf16.msra.mxu1 %v3783_v19  ;;  %2207 = vmatprep.subr.bf16.mxu0 %v3789_v32 }
 0x524   :  { %2248 = vmatprep.subr.bf16.mxu1 %v3795_v45 }
 0x526   :  { %2208 = vmatpush1.bf16.msra.mxu0 %v3801_v46 }
 0x527   :  { %2249 = vmatpush1.bf16.msra.mxu1 %v3807_v47  ;;  %2209 = vmatprep.subr.bf16.mxu0 %v3813_v48 }
 0x528   :  { %2250 = vmatprep.subr.bf16.mxu1 %v3819_v49 }
 0x52a   :  { %2210 = vmatpush1.bf16.msra.mxu0 %v3825_v50 }
 0x52b   :  { %2251 = vmatpush1.bf16.msra.mxu1 %v3831_v51  ;;  %2211 = vmatprep.subr.bf16.mxu0 %v3837_v52 }
 0x52c   :  { %2252 = vmatprep.subr.bf16.mxu1 %v3843_v53 }
 0x52e   :  { %2212 = vmatpush1.bf16.msra.mxu0 %v3849_v54 }
 0x52f   :  { %2253 = vmatpush1.bf16.msra.mxu1 %v3855_v55  ;;  %2213 = vmatprep.subr.bf16.mxu0 %v3861_v56 }
 0x530   :  { %2254 = vmatprep.subr.bf16.mxu1 %v3867_v57 }
 0x532   :  { %2214 = vmatpush1.bf16.msra.mxu0 %v3873_v58 }
 0x533   :  { %2255 = vmatpush1.bf16.msra.mxu1 %v3879_v59  ;;  %2374 = vmatprep.subr.bf16.mxu0 %v3885_v43  ;;  %v4146_v43 = vld [vmem:[#allocation17_spill] sm:$0xff] }
 0x534   :  { %2415 = vmatprep.subr.bf16.mxu1 %v3891_v31 }
 0x5d5   :  { %v2058_v13 = vpop.f32.mrf.mxu0 }
 0x5d6   :  { %v2099_v25 = vpop.f32.mrf.mxu1  ;;  %v2106_v21 = vadd.f32 %v2058_v13, %v4143_v15 }
 0x5d7   :  { %v2060_v12 = vpop.f32.mrf.mxu0  ;;  %v2108_v62 = vadd.f32 %v2099_v25, %v4145_v61 }
 0x5d8   :  { %v2101_v29 = vpop.f32.mrf.mxu1  ;;  %v2110_v38 = vmul.f32 0.5, %v2106_v21  ;;  %v2107_v30 = vadd.f32 %v2060_v12, %v4144_v40 }
 0x5d9   :  { %v2062_v6 = vpop.f32.mrf.mxu0  ;;  %v2109_v31 = vadd.f32 %v2101_v29, %v4146_v43 }
 0x5da   :  { %v2103_v60 = vpop.f32.mrf.mxu1  ;;  %2755 = vtanh.f32 %v2110_v38  ;;  %v2114_v63 = vmul.f32 0.5, %v2107_v30 }
 0x5db   :  { %v2063_v0 = vpop.f32.mrf.mxu0  ;;  %v2119_v3 = vmul.f32 0.5, %v2109_v31 }
 0x5dc   :  { %v2104_v1 = vpop.f32.mrf.mxu1  ;;  %2757 = vtanh.f32 %v2114_v63 }
 0x5dd   :  { %2759 = vtanh.f32 %v2108_v62 }
 0x5de   :  { %2761 = vtanh.f32 %v2119_v3 }
 0x5e7   :  { %v2756_v5 = vpop.eup %2755 }
 0x5e8   :  { %v2112_v7 = vmul.f32 0.5, %v2756_v5 }
 0x5e9   :  { %v2758_v8 = vpop.eup %2757 }
 0x5ea   :  { %v2113_v37 = vadd.f32 0.5, %v2112_v7  ;;  %v2116_v9 = vmul.f32 0.5, %v2758_v8  ;;  %v2760_v42 = vpop.eup %2759 }
 0x5eb   :  { %v2762_v27 = vpop.eup %2761 }
 0x5ec   :  { %v2117_v23 = vadd.f32 0.5, %v2116_v9  ;;  %v2124_v26 = vmul.f32 %v2760_v42, %v2113_v37  ;;  %v2121_v35 = vmul.f32 0.5, %v2762_v27 }
 0x5ee   :  { %v2123_v24 = vmul.f32 %v2117_v23, %v3899_v36  ;;  %v2122_v13 = vadd.f32 0.5, %v2121_v35 }
 0x5f0   :  { %v3971_v20 = vadd.f32 %v2124_v26, %v2123_v24 }
 0x5f2   :  { %2763 = vtanh.f32 %v3971_v20 }
 0x5ff   :  { %v2764_v25 = vpop.eup %2763 }
 0x600   :  { %v2127_v15 = vmul.f32 %v2764_v25, %v2122_v13 }
 0x602   :  { %v2129_v21 = vcombine.high %v2127_v15, %v2127_v15  ;;  %v2136_v12 = vrot.slane %v2127_v15, %v3452_v22  ;;  %v2198_v29 = vpack.c.bf16 %v2127_v15, %v2127_v15 }
 0x604   :  { %v2143_v38 = vrot.slane %v2129_v21, %v3452_v22  ;;  %v2144_v40 = vcombine.high %v2136_v12, %v2136_v12  ;;  %v2152_v30 = vrot.slane %v2136_v12, %v3452_v22  ;;  %2638 = vst.sshfl [vmem:[%s4109_s4 + $0x5] sm:$0x1 pattern:$0x73625140] %v2136_v12  ;;  %2232 = vmatmul.mubr.bf16.vlgmr.msra.gmra.mxu0 %v2198_v29  ;;  %v4151_v12 = vld [vmem:[#allocation22_spill] sm:$0xff] }
 0x605   :  { %2273 = vmatmul.mubr.bf16.vlgmr.msra.gmra.mxu1 %v2198_v29  ;;  %2375 = vmatpush1.bf16.msra.mxu0 %v3679_v33 }
 0x606   :  { %2416 = vmatpush1.bf16.msra.mxu1 %v3685_v28  ;;  %v2145_v36 = vcombine.high %v2143_v38, %v2143_v38  ;;  %v2159_v6 = vrot.slane %v2143_v38, %v3452_v22  ;;  %v2166_v60 = vrot.slane %v2144_v40, %v3452_v22  ;;  %v2174_v61 = vcombine.high %v2152_v30, %v2152_v30 }
 0x607   :  { %2639 = vst.sshfl [vmem:[%s4109_s4 + $0xd] sm:$0x1 pattern:$0x73625140] %v2144_v40  ;;  %2376 = vmatprep.subr.bf16.mxu0 %v3699_v4  ;;  %2417 = vmatprep.subr.bf16.mxu1 %v3705_v14 }
 0x608   :  { %2640 = vst.sshfl [vmem:[%s4109_s4 + $0x25] sm:$0x1 pattern:$0x73625140] %v2143_v38  ;;  %2406 = vmatprep.mubr.bf16.mxu0 %v4133_v34  ;;  %v2173_v33 = vrot.slane %v2145_v36, %v3452_v22  ;;  %v2175_v28 = vcombine.high %v2159_v6, %v2159_v6  ;;  %v2176_v62 = vcombine.high %v2166_v60, %v2166_v60  ;;  %2188 = vst [vmem:[%s4109_s4 + $0x15] sm:$0x1] %v2174_v61 }
 0x609   :  { %2641 = vst.sshfl [vmem:[%s4109_s4 + $0x2d] sm:$0x1 pattern:$0x73625140] %v2145_v36  ;;  %2447 = vmatprep.mubr.bf16.mxu1 %v4133_v34  ;;  %2377 = vmatpush1.bf16.msra.mxu0 %v3720_v2  ;;  %v4147_v2 = vld [vmem:[#allocation18_spill] sm:$0xff]  ;;  %v4152_v36 = vld [vmem:[#allocation24_spill] sm:$0xff] }
 0x60a   :  { %2418 = vmatpush1.bf16.msra.mxu1 %v3726_v10  ;;  %v2177_v4 = vcombine.high %v2173_v33, %v2173_v33  ;;  %2189 = vst [vmem:[%s4109_s4 + $0x1d] sm:$0x1] %v2176_v62  ;;  %2192 = vst [vmem:[%s4109_s4 + $0x35] sm:$0x1] %v2175_v28  ;;  %2378 = vmatprep.subr.bf16.mxu0 %v3738_v39  ;;  %v4153_v33 = vld [vmem:[#allocation23_spill] sm:$0xff] }
 0x60b   :  { %2419 = vmatprep.subr.bf16.mxu1 %v3744_v11 }
 0x60c   :  { %2193 = vst [vmem:[%s4109_s4 + $0x3d] sm:$0x1] %v2177_v4 }
 0x60d   :  { %2379 = vmatpush1.bf16.msra.mxu0 %v3753_v17 }
 0x60e   :  { %2420 = vmatpush1.bf16.msra.mxu1 %v3759_v41  ;;  %2380 = vmatprep.subr.bf16.mxu0 %v3765_v44  ;;  %v4148_v41 = vld [vmem:[#allocation20_spill] sm:$0xff] }
 0x60f   :  { %2421 = vmatprep.subr.bf16.mxu1 %v3771_v18 }
 0x611   :  { %2381 = vmatpush1.bf16.msra.mxu0 %v3777_v16 }
 0x612   :  { %2422 = vmatpush1.bf16.msra.mxu1 %v3783_v19  ;;  %2382 = vmatprep.subr.bf16.mxu0 %v3789_v32  ;;  %v4149_v19 = vld [vmem:[#allocation19_spill] sm:$0xff] }
 0x613   :  { %2423 = vmatprep.subr.bf16.mxu1 %v3795_v45 }
 0x615   :  { %2383 = vmatpush1.bf16.msra.mxu0 %v3801_v46 }
 0x616   :  { %2424 = vmatpush1.bf16.msra.mxu1 %v3807_v47  ;;  %2384 = vmatprep.subr.bf16.mxu0 %v3813_v48  ;;  %v4150_v48 = vld [vmem:[#allocation21_spill] sm:$0xff] }
 0x617   :  { %2425 = vmatprep.subr.bf16.mxu1 %v3819_v49 }
 0x619   :  { %2385 = vmatpush1.bf16.msra.mxu0 %v3825_v50 }
 0x61a   :  { %2426 = vmatpush1.bf16.msra.mxu1 %v3831_v51  ;;  %2386 = vmatprep.subr.bf16.mxu0 %v3837_v52 }
 0x61b   :  { %2427 = vmatprep.subr.bf16.mxu1 %v3843_v53 }
 0x61d   :  { %2387 = vmatpush1.bf16.msra.mxu0 %v3849_v54 }
 0x61e   :  { %2428 = vmatpush1.bf16.msra.mxu1 %v3855_v55  ;;  %2388 = vmatprep.subr.bf16.mxu0 %v3861_v56 }
 0x61f   :  { %2429 = vmatprep.subr.bf16.mxu1 %v3867_v57 }
 0x621   :  { %2389 = vmatpush1.bf16.msra.mxu0 %v3873_v58 }
 0x622   :  { %2430 = vmatpush1.bf16.msra.mxu1 %v3879_v59 }
 0x6c4   :  { %v2233_v34 = vpop.f32.mrf.mxu0 }
 0x6c5   :  { %v2274_v14 = vpop.f32.mrf.mxu1  ;;  %v2281_v10 = vadd.f32 %v2233_v34, %v4147_v2 }
 0x6c6   :  { %v2235_v39 = vpop.f32.mrf.mxu0  ;;  %v2283_v32 = vadd.f32 %v2274_v14, %v4149_v19  ;;  %v4154_v14 = vld [vmem:[#allocation25_spill] sm:$0xff] }
 0x6c7   :  { %v2276_v11 = vpop.f32.mrf.mxu1  ;;  %v2285_v17 = vmul.f32 0.5, %v2281_v10  ;;  %v2282_v44 = vadd.f32 %v2235_v39, %v4148_v41 }
 0x6c8   :  { %v2237_v18 = vpop.f32.mrf.mxu0  ;;  %v2284_v49 = vadd.f32 %v2276_v11, %v4150_v48 }
 0x6c9   :  { %v2278_v16 = vpop.f32.mrf.mxu1  ;;  %2765 = vtanh.f32 %v2285_v17  ;;  %v2289_v45 = vmul.f32 0.5, %v2282_v44 }
 0x6ca   :  { %v2238_v46 = vpop.f32.mrf.mxu0  ;;  %v2294_v50 = vmul.f32 0.5, %v2284_v49 }
 0x6cb   :  { %v2279_v47 = vpop.f32.mrf.mxu1  ;;  %2767 = vtanh.f32 %v2289_v45 }
 0x6cc   :  { %2769 = vtanh.f32 %v2283_v32 }
 0x6cd   :  { %2771 = vtanh.f32 %v2294_v50 }
 0x6d6   :  { %v2766_v51 = vpop.eup %2765 }
 0x6d7   :  { %v2287_v52 = vmul.f32 0.5, %v2766_v51 }
 0x6d8   :  { %v2768_v53 = vpop.eup %2767 }
 0x6d9   :  { %v2288_v54 = vadd.f32 0.5, %v2287_v52  ;;  %v2291_v55 = vmul.f32 0.5, %v2768_v53  ;;  %v2770_v56 = vpop.eup %2769 }
 0x6da   :  { %v2772_v0 = vpop.eup %2771 }
 0x6db   :  { %v2292_v57 = vadd.f32 0.5, %v2291_v55  ;;  %v2299_v58 = vmul.f32 %v2770_v56, %v2288_v54  ;;  %v2296_v1 = vmul.f32 0.5, %v2772_v0 }
 0x6dd   :  { %v2298_v59 = vmul.f32 %v2292_v57, %v3971_v20  ;;  %v2297_v43 = vadd.f32 0.5, %v2296_v1 }
 0x6df   :  { %v2300_v63 = vadd.f32 %v2299_v58, %v2298_v59 }
 0x6e1   :  { %2773 = vtanh.f32 %v2300_v63 }
 0x6ee   :  { %v2774_v31 = vpop.eup %2773 }
 0x6ef   :  { %v2302_v3 = vmul.f32 %v2774_v31, %v2297_v43 }
 0x6f1   :  { %v2304_v5 = vcombine.high %v2302_v3, %v2302_v3  ;;  %v2311_v7 = vrot.slane %v2302_v3, %v3452_v22  ;;  %v2373_v8 = vpack.c.bf16 %v2302_v3, %v2302_v3 }
 0x6f3   :  { %v2318_v37 = vrot.slane %v2304_v5, %v3452_v22  ;;  %v2319_v9 = vcombine.high %v2311_v7, %v2311_v7  ;;  %v2327_v42 = vrot.slane %v2311_v7, %v3452_v22  ;;  %2642 = vst.sshfl [vmem:[%s4109_s4 + $0x6] sm:$0x1 pattern:$0x73625140] %v2311_v7  ;;  %2407 = vmatmul.mubr.bf16.vlgmr.msra.gmra.mxu0 %v2373_v8 }
 0x6f4   :  { %2448 = vmatmul.mubr.bf16.vlgmr.msra.gmra.mxu1 %v2373_v8 }
 0x6f5   :  { %v2320_v23 = vcombine.high %v2318_v37, %v2318_v37  ;;  %v2334_v26 = vrot.slane %v2318_v37, %v3452_v22  ;;  %v2341_v24 = vrot.slane %v2319_v9, %v3452_v22  ;;  %v2349_v20 = vcombine.high %v2327_v42, %v2327_v42  ;;  %2643 = vst.sshfl [vmem:[%s4109_s4 + $0xe] sm:$0x1 pattern:$0x73625140] %v2319_v9 }
 0x6f6   :  { %2644 = vst.sshfl [vmem:[%s4109_s4 + $0x26] sm:$0x1 pattern:$0x73625140] %v2318_v37 }
 0x6f7   :  { %v2348_v27 = vrot.slane %v2320_v23, %v3452_v22  ;;  %v2350_v35 = vcombine.high %v2334_v26, %v2334_v26  ;;  %v2351_v13 = vcombine.high %v2341_v24, %v2341_v24  ;;  %2363 = vst [vmem:[%s4109_s4 + $0x16] sm:$0x1] %v2349_v20  ;;  %2645 = vst.sshfl [vmem:[%s4109_s4 + $0x2e] sm:$0x1 pattern:$0x73625140] %v2320_v23 }
 0x6f9   :  { %v2352_v25 = vcombine.high %v2348_v27, %v2348_v27  ;;  %2364 = vst [vmem:[%s4109_s4 + $0x1e] sm:$0x1] %v2351_v13  ;;  %2367 = vst [vmem:[%s4109_s4 + $0x36] sm:$0x1] %v2350_v35 }
 0x6fb   :  { %2368 = vst [vmem:[%s4109_s4 + $0x3e] sm:$0x1] %v2352_v25 }
 0x7b3   :  { %v2408_v15 = vpop.f32.mrf.mxu0 }
 0x7b4   :  { %v2449_v21 = vpop.f32.mrf.mxu1  ;;  %v2456_v29 = vadd.f32 %v2408_v15, %v4151_v12 }
 0x7b5   :  { %v2410_v38 = vpop.f32.mrf.mxu0  ;;  %v2458_v28 = vadd.f32 %v2449_v21, %v4153_v33 }
 0x7b6   :  { %v2451_v40 = vpop.f32.mrf.mxu1  ;;  %v2460_v30 = vmul.f32 0.5, %v2456_v29  ;;  %v2457_v6 = vadd.f32 %v2410_v38, %v4152_v36 }
 0x7b7   :  { %v2412_v60 = vpop.f32.mrf.mxu0  ;;  %v2459_v2 = vadd.f32 %v2451_v40, %v4154_v14 }
 0x7b8   :  { %v2453_v61 = vpop.f32.mrf.mxu1  ;;  %2775 = vtanh.f32 %v2460_v30  ;;  %v2464_v62 = vmul.f32 0.5, %v2457_v6 }
 0x7b9   :  { %v2413_v4 = vpop.f32.mrf.mxu0  ;;  %v2469_v10 = vmul.f32 0.5, %v2459_v2 }
 0x7ba   :  { %v2454_v34 = vpop.f32.mrf.mxu1  ;;  %2777 = vtanh.f32 %v2464_v62 }
 0x7bb   :  { %2779 = vtanh.f32 %v2458_v28 }
 0x7bc   :  { %2781 = vtanh.f32 %v2469_v10 }
 0x7c5   :  { %v2776_v39 = vpop.eup %2775 }
 0x7c6   :  { %v2462_v11 = vmul.f32 0.5, %v2776_v39 }
 0x7c7   :  { %v2778_v17 = vpop.eup %2777 }
 0x7c8   :  { %v2463_v41 = vadd.f32 0.5, %v2462_v11  ;;  %v2466_v44 = vmul.f32 0.5, %v2778_v17  ;;  %v2780_v18 = vpop.eup %2779 }
 0x7c9   :  { %v2782_v46 = vpop.eup %2781 }
 0x7ca   :  { %v2467_v16 = vadd.f32 0.5, %v2466_v44  ;;  %v2474_v19 = vmul.f32 %v2780_v18, %v2463_v41  ;;  %v2471_v47 = vmul.f32 0.5, %v2782_v46 }
 0x7cc   :  { %v2473_v32 = vmul.f32 %v2467_v16, %v2300_v63  ;;  %v2472_v48 = vadd.f32 0.5, %v2471_v47 }
 0x7ce   :  { %v2475_v45 = vadd.f32 %v2474_v19, %v2473_v32 }
 0x7d0   :  { %2783 = vtanh.f32 %v2475_v45 }
 0x7dd   :  { %v2784_v49 = vpop.eup %2783 }
 0x7de   :  { %v2477_v50 = vmul.f32 %v2784_v49, %v2472_v48 }
 0x7e0   :  { %v2479_v51 = vcombine.high %v2477_v50, %v2477_v50  ;;  %v2486_v52 = vrot.slane %v2477_v50, %v3452_v22 }
 0x7e2   :  { %v2493_v53 = vrot.slane %v2479_v51, %v3452_v22  ;;  %v2494_v54 = vcombine.high %v2486_v52, %v2486_v52  ;;  %v2502_v55 = vrot.slane %v2486_v52, %v3452_v22  ;;  %2646 = vst.sshfl [vmem:[%s4109_s4 + $0x7] sm:$0x1 pattern:$0x73625140] %v2486_v52 }
 0x7e4   :  { %v2495_v56 = vcombine.high %v2493_v53, %v2493_v53  ;;  %v2509_v57 = vrot.slane %v2493_v53, %v3452_v22  ;;  %v2516_v58 = vrot.slane %v2494_v54, %v3452_v22  ;;  %v2524_v59 = vcombine.high %v2502_v55, %v2502_v55  ;;  %2647 = vst.sshfl [vmem:[%s4109_s4 + $0xf] sm:$0x1 pattern:$0x73625140] %v2494_v54 }
 0x7e5   :  { %2648 = vst.sshfl [vmem:[%s4109_s4 + $0x27] sm:$0x1 pattern:$0x73625140] %v2493_v53 }
 0x7e6   :  { %v2523_v63 = vrot.slane %v2495_v56, %v3452_v22  ;;  %v2525_v0 = vcombine.high %v2509_v57, %v2509_v57  ;;  %v2526_v1 = vcombine.high %v2516_v58, %v2516_v58  ;;  %2538 = vst [vmem:[%s4109_s4 + $0x17] sm:$0x1] %v2524_v59  ;;  %2649 = vst.sshfl [vmem:[%s4109_s4 + $0x2f] sm:$0x1 pattern:$0x73625140] %v2495_v56 }
 0x7e8   :  { %v2527_v43 = vcombine.high %v2523_v63, %v2523_v63  ;;  %2539 = vst [vmem:[%s4109_s4 + $0x1f] sm:$0x1] %v2526_v1  ;;  %2542 = vst [vmem:[%s4109_s4 + $0x37] sm:$0x1] %v2525_v0 }
 0x7ea   :  { %2543 = vst [vmem:[%s4109_s4 + $0x3f] sm:$0x1] %v2527_v43 }

</bundles_post_ra>
